<compile_context>
chip_gen: v5e
topology: v5e:2x2
jax: 0.10.0
libtpu: 0.0.40
codegen_flags: <defaults>
</compile_context>

<pallas_src>
import functools

import jax
import jax.numpy as jnp
from jax.experimental import pallas as pl
from jax.experimental.pallas import tpu as pltpu

_EPS = 1e-5        # nn.BatchNorm2d default
_SLOPE = 0.01      # nn.LeakyReLU default negative_slope
_CHUNK = 512       # lane chunk (multiple of 128)


def _round_up(v: int, m: int) -> int:
    return (v + m - 1) // m * m


# ----------------------------------------------------------------------------
# Pallas kernel: one batch element per grid step.
# ----------------------------------------------------------------------------
def _res_context_kernel(x_ref, mask_ref, w1_ref, b1_ref,
                        w2_ref, b2_ref, s1_ref, t1_ref,
                        w3_ref, b3_ref, s2_ref, t2_ref,
                        o_ref, sc_ref, r1_ref,
                        *, wp, base, chunk, slope):
    c_out = w1_ref.shape[0]
    l_pad = sc_ref.shape[1]
    s_pad = o_ref.shape[-1]

    # Tap offsets in the flattened padded image (row stride = wp).
    taps1 = [dy * wp + dx for dy in (-1, 0, 1) for dx in (-1, 0, 1)]        # dil 1
    taps2 = [2 * (dy * wp + dx) for dy in (-1, 0, 1) for dx in (-1, 0, 1)]  # dil 2

    def lrelu(v):
        return jnp.where(v >= 0, v, slope * v)

    w1 = w1_ref[...]
    b1 = b1_ref[...]

    # Phase 1: 1x1 conv + LeakyReLU over the whole padded buffer.  The mask
    # forces zero-padding positions back to exactly 0 (conv bias + LeakyReLU
    # would otherwise pollute them).  Also zero-init the resA1 buffer.
    for c in range(l_pad // chunk):
        lo = c * chunk
        pre = jnp.dot(w1, x_ref[:, lo:lo + chunk],
                      preferred_element_type=jnp.float32) + b1
        sc_ref[:, lo:lo + chunk] = lrelu(pre) * mask_ref[:, lo:lo + chunk]
        r1_ref[:, lo:lo + chunk] = jnp.zeros((c_out, chunk), jnp.float32)

    # Phase 2: 3x3 conv (pad 1) + LeakyReLU + BN1 -> resA1 (masked so the
    # zero padding seen by the dilated conv stays exactly zero).
    b2 = b2_ref[...]
    s1 = s1_ref[...]
    t1 = t1_ref[...]
    for c in range(s_pad // chunk):
        so = c * chunk
        acc = jnp.zeros((c_out, chunk), jnp.float32)
        for t in range(9):
            lo = base + taps1[t] + so
            acc = acc + jnp.dot(w2_ref[t], sc_ref[:, lo:lo + chunk],
                                preferred_element_type=jnp.float32)
        r1 = lrelu(acc + b2) * s1 + t1
        r1_ref[:, base + so:base + so + chunk] = (
            r1 * mask_ref[:, base + so:base + so + chunk])

    # Phase 3: 3x3 conv (dilation 2, pad 2) + LeakyReLU + BN2 + shortcut add.
    b3 = b3_ref[...]
    s2 = s2_ref[...]
    t2 = t2_ref[...]
    for c in range(s_pad // chunk):
        so = c * chunk
        acc = jnp.zeros((c_out, chunk), jnp.float32)
        for t in range(9):
            lo = base + taps2[t] + so
            acc = acc + jnp.dot(w3_ref[t], r1_ref[:, lo:lo + chunk],
                                preferred_element_type=jnp.float32)
        resa2 = lrelu(acc + b3) * s2 + t2
        o_ref[:, so:so + chunk] = (
            sc_ref[:, base + so:base + so + chunk] + resa2).astype(o_ref.dtype)


# ----------------------------------------------------------------------------
# Wrapper: layout preparation + pallas_call.
# ----------------------------------------------------------------------------
def res_context_block(x, params, *, eps=_EPS, slope=_SLOPE, chunk=_CHUNK):
    n, c_in, h, w = x.shape
    c_out = params["w1"].shape[0]

    hp, wp = h + 4, w + 4                 # pad 2 on every side (covers both convs)
    base = _round_up(2 * wp + 2, 128)     # 128-aligned start of the output span
    off0 = base - 2 * wp                  # flat offset where the padded image starts
    span = h * wp                         # output span length (interior rows, all cols)
    s_pad = _round_up(span, chunk)
    l_pad = _round_up(base + s_pad + 2 * wp + 2, chunk)

    # Padded, flattened input image placed at offset `off0`; zeros elsewhere.
    xp = jnp.pad(x, ((0, 0), (0, 0), (2, 2), (2, 2))).reshape(n, c_in, hp * wp)
    x_flat = jnp.pad(xp, ((0, 0), (0, 0), (off0, l_pad - hp * wp - off0)))

    # Interior mask (1 inside the original HxW image, 0 at padding/margins).
    mask2d = jnp.pad(jnp.ones((h, w), jnp.float32), ((2, 2), (2, 2)))
    mask = jnp.pad(mask2d.reshape(1, hp * wp),
                   ((0, 0), (off0, l_pad - hp * wp - off0)))

    # Weights: conv1 as a plain matrix, conv2/conv3 as 9 per-tap matrices.
    w1 = params["w1"].reshape(c_out, c_in).astype(jnp.float32)
    c_in_pad = _round_up(c_in, 8)
    if c_in_pad != c_in:                  # pad the contraction dim to a sublane multiple
        x_flat = jnp.pad(x_flat, ((0, 0), (0, c_in_pad - c_in), (0, 0)))
        w1 = jnp.pad(w1, ((0, 0), (0, c_in_pad - c_in)))
    w2t = jnp.transpose(params["w2"], (2, 3, 0, 1)).reshape(9, c_out, c_out)
    w3t = jnp.transpose(params["w3"], (2, 3, 0, 1)).reshape(9, c_out, c_out)

    def fold_bn(g, b, m, v):
        s = g * jax.lax.rsqrt(v + eps)
        return s.reshape(c_out, 1), (b - m * s).reshape(c_out, 1)

    s1, t1 = fold_bn(params["bn1_g"], params["bn1_b"],
                     params["bn1_m"], params["bn1_v"])
    s2, t2 = fold_bn(params["bn2_g"], params["bn2_b"],
                     params["bn2_m"], params["bn2_v"])
    b1 = params["b1"].reshape(c_out, 1)
    b2 = params["b2"].reshape(c_out, 1)
    b3 = params["b3"].reshape(c_out, 1)

    kernel = functools.partial(_res_context_kernel,
                               wp=wp, base=base, chunk=chunk, slope=slope)

    def cvec():
        return pl.BlockSpec((c_out, 1), lambda i: (0, 0))

    out_flat = pl.pallas_call(
        kernel,
        out_shape=jax.ShapeDtypeStruct((n, c_out, s_pad), x.dtype),
        grid_spec=pltpu.PrefetchScalarGridSpec(
            num_scalar_prefetch=0,
            grid=(n,),
            in_specs=[
                pl.BlockSpec((None, c_in_pad, l_pad), lambda i: (i, 0, 0)),  # x
                pl.BlockSpec((1, l_pad), lambda i: (0, 0)),                  # mask
                pl.BlockSpec((c_out, c_in_pad), lambda i: (0, 0)),           # w1
                cvec(),                                                      # b1
                pl.BlockSpec((9, c_out, c_out), lambda i: (0, 0, 0)),        # w2 taps
                cvec(),                                                      # b2
                cvec(),                                                      # bn1 scale
                cvec(),                                                      # bn1 bias
                pl.BlockSpec((9, c_out, c_out), lambda i: (0, 0, 0)),        # w3 taps
                cvec(),                                                      # b3
                cvec(),                                                      # bn2 scale
                cvec(),                                                      # bn2 bias
            ],
            out_specs=pl.BlockSpec((None, c_out, s_pad), lambda i: (i, 0, 0)),
            scratch_shapes=[pltpu.VMEM((c_out, l_pad), jnp.float32),   # shortcut
                            pltpu.VMEM((c_out, l_pad), jnp.float32)],  # resA1
        ),
        compiler_params=pltpu.CompilerParams(
            dimension_semantics=("parallel",)),
    )(x_flat, mask, w1, b1, w2t, b2, s1, t1, w3t, b3, s2, t2)

    # Span index s  <->  padded coords (2 + s // wp, s % wp); keep interior cols.
    out = out_flat[:, :, :span].reshape(n, c_out, h, wp)[:, :, :, 2:2 + w]
    return out


# ----------------------------------------------------------------------------
# Pure-JAX reference (same math, lax convolutions) for a correctness check.
# ----------------------------------------------------------------------------
def _ref_forward(x, p, *, eps=_EPS, slope=_SLOPE):
    def conv(inp, wgt, b, pad, dil):
        out = jax.lax.conv_general_dilated(
            inp, wgt, window_strides=(1, 1),
            padding=((pad, pad), (pad, pad)),
            rhs_dilation=(dil, dil),
            dimension_numbers=("NCHW", "OIHW", "NCHW"),
            precision=jax.lax.Precision.HIGHEST)
        return out + b[None, :, None, None]

    def lrelu(v):
        return jnp.where(v >= 0, v, slope * v)

    def bn(v, g, b, m, var):
        s = g * jax.lax.rsqrt(var + eps)
        return v * s[None, :, None, None] + (b - m * s)[None, :, None, None]

    shortcut = lrelu(conv(x, p["w1"], p["b1"], 0, 1))
    resa = lrelu(conv(shortcut, p["w2"], p["b2"], 1, 1))
    resa1 = bn(resa, p["bn1_g"], p["bn1_b"], p["bn1_m"], p["bn1_v"])
    resa = lrelu(conv(resa1, p["w3"], p["b3"], 2, 2))
    resa2 = bn(resa, p["bn2_g"], p["bn2_b"], p["bn2_m"], p["bn2_v"])
    return shortcut + resa2


if __name__ == "__main__":
    key = jax.random.PRNGKey(0)
    ks = jax.random.split(key, 16)
    N, C_IN, C_OUT, H, W = 2, 4, 8, 16, 16

    params = {
        "w1": 0.3 * jax.random.normal(ks[0], (C_OUT, C_IN, 1, 1), jnp.float32),
        "b1": 0.1 * jax.random.normal(ks[1], (C_OUT,), jnp.float32),
        "w2": 0.15 * jax.random.normal(ks[2], (C_OUT, C_OUT, 3, 3), jnp.float32),
        "b2": 0.1 * jax.random.normal(ks[3], (C_OUT,), jnp.float32),
        "w3": 0.15 * jax.random.normal(ks[4], (C_OUT, C_OUT, 3, 3), jnp.float32),
        "b3": 0.1 * jax.random.normal(ks[5], (C_OUT,), jnp.float32),
        "bn1_g": 1.0 + 0.1 * jax.random.normal(ks[6], (C_OUT,), jnp.float32),
        "bn1_b": 0.1 * jax.random.normal(ks[7], (C_OUT,), jnp.float32),
        "bn1_m": 0.1 * jax.random.normal(ks[8], (C_OUT,), jnp.float32),
        "bn1_v": 0.8 + 0.4 * jax.random.uniform(ks[9], (C_OUT,), jnp.float32),
        "bn2_g": 1.0 + 0.1 * jax.random.normal(ks[10], (C_OUT,), jnp.float32),
        "bn2_b": 0.1 * jax.random.normal(ks[11], (C_OUT,), jnp.float32),
        "bn2_m": 0.1 * jax.random.normal(ks[12], (C_OUT,), jnp.float32),
        "bn2_v": 0.8 + 0.4 * jax.random.uniform(ks[13], (C_OUT,), jnp.float32),
    }
    x = jax.random.normal(ks[14], (N, C_IN, H, W), jnp.float32)

    out = jax.block_until_ready(jax.jit(res_context_block)(x, params))
    assert out.shape == (N, C_OUT, H, W), out.shape

    ref = jax.block_until_ready(_ref_forward(x, params))
    max_err = float(jnp.max(jnp.abs(out - ref)))
    assert jnp.allclose(out, ref, atol=2e-3, rtol=2e-3), max_err

    print("KERNEL_OK")
</pallas_src>

<mosaic_0001>
module attributes {stable_mosaic.version = 11 : i64} {
  func.func @_res_context_kernel(%arg0: i32, %arg1: memref<1x8x1024xf32, #tpu.memory_space<vmem>>, %arg2: memref<1x1024xf32, #tpu.memory_space<vmem>>, %arg3: memref<8x8xf32, #tpu.memory_space<vmem>>, %arg4: memref<8x1xf32, #tpu.memory_space<vmem>>, %arg5: memref<9x8x8xf32, #tpu.memory_space<vmem>>, %arg6: memref<8x1xf32, #tpu.memory_space<vmem>>, %arg7: memref<8x1xf32, #tpu.memory_space<vmem>>, %arg8: memref<8x1xf32, #tpu.memory_space<vmem>>, %arg9: memref<9x8x8xf32, #tpu.memory_space<vmem>>, %arg10: memref<8x1xf32, #tpu.memory_space<vmem>>, %arg11: memref<8x1xf32, #tpu.memory_space<vmem>>, %arg12: memref<8x1xf32, #tpu.memory_space<vmem>>, %arg13: memref<1x8x512xf32, #tpu.memory_space<vmem>>, %arg14: memref<8x1024xf32, #tpu.memory_space<vmem>>, %arg15: memref<8x1024xf32, #tpu.memory_space<vmem>>) attributes {dimension_semantics = [#tpu.dimension_semantics<parallel>], iteration_bounds = array<i64: 2>, scalar_prefetch = 0 : i64, scratch_operands = 2 : i64, tpu.core_type = #tpu.core_type<tc>, window_params = [{transform_indices = @transform_0, window_bounds = array<i64: 1, 8, 1024>}, {pipeline_mode = #tpu.pipeline_mode<synchronous>, transform_indices = @transform_1, window_bounds = array<i64: 1, 1024>}, {pipeline_mode = #tpu.pipeline_mode<synchronous>, transform_indices = @transform_2, window_bounds = array<i64: 8, 8>}, {pipeline_mode = #tpu.pipeline_mode<synchronous>, transform_indices = @transform_3, window_bounds = array<i64: 8, 1>}, {pipeline_mode = #tpu.pipeline_mode<synchronous>, transform_indices = @transform_4, window_bounds = array<i64: 9, 8, 8>}, {pipeline_mode = #tpu.pipeline_mode<synchronous>, transform_indices = @transform_5, window_bounds = array<i64: 8, 1>}, {pipeline_mode = #tpu.pipeline_mode<synchronous>, transform_indices = @transform_6, window_bounds = array<i64: 8, 1>}, {pipeline_mode = #tpu.pipeline_mode<synchronous>, transform_indices = @transform_7, window_bounds = array<i64: 8, 1>}, {pipeline_mode = #tpu.pipeline_mode<synchronous>, transform_indices = @transform_8, window_bounds = array<i64: 9, 8, 8>}, {pipeline_mode = #tpu.pipeline_mode<synchronous>, transform_indices = @transform_9, window_bounds = array<i64: 8, 1>}, {pipeline_mode = #tpu.pipeline_mode<synchronous>, transform_indices = @transform_10, window_bounds = array<i64: 8, 1>}, {pipeline_mode = #tpu.pipeline_mode<synchronous>, transform_indices = @transform_11, window_bounds = array<i64: 8, 1>}, {transform_indices = @transform_12, window_bounds = array<i64: 1, 8, 512>}]} {
    %c0 = arith.constant 0 : index
    %c0_0 = arith.constant 0 : index
    %0 = vector.load %arg3[%c0, %c0_0] : memref<8x8xf32, #tpu.memory_space<vmem>>, vector<8x8xf32>
    %c0_1 = arith.constant 0 : index
    %c0_2 = arith.constant 0 : index
    %1 = vector.load %arg4[%c0_1, %c0_2] : memref<8x1xf32, #tpu.memory_space<vmem>>, vector<8x1xf32>
    %c0_3 = arith.constant 0 : index
    %c0_4 = arith.constant 0 : index
    %c0_5 = arith.constant 0 : index
    %2 = vector.load %arg1[%c0_3, %c0_4, %c0_5] : memref<1x8x1024xf32, #tpu.memory_space<vmem>>, vector<1x8x512xf32>
    %3 = vector.shape_cast %2 : vector<1x8x512xf32> to vector<8x512xf32>
    %cst = arith.constant dense<0.000000e+00> : vector<8x512xf32>
    %4 = tpu.matmul %0, %3, %cst {dimension_numbers = #tpu.dot_dimension_numbers<[1], [0], [0], [1], [0, 0, 1, 1], [], []>} : vector<8x8xf32>, vector<8x512xf32>, vector<8x512xf32> -> vector<8x512xf32>
    %5 = vector.broadcast %1 : vector<8x1xf32> to vector<8x512xf32>
    %6 = arith.addf %4, %5 : vector<8x512xf32>
    %cst_6 = arith.constant 0.000000e+00 : f32
    %7 = vector.broadcast %cst_6 : f32 to vector<8x512xf32>
    %8 = arith.cmpf oge, %6, %7 : vector<8x512xf32>
    %cst_7 = arith.constant 0.00999999977 : f32
    %9 = vector.broadcast %cst_7 : f32 to vector<8x512xf32>
    %10 = arith.mulf %9, %6 : vector<8x512xf32>
    %11 = arith.select %8, %6, %10 : vector<8x512xi1>, vector<8x512xf32>
    %c0_8 = arith.constant 0 : index
    %c0_9 = arith.constant 0 : index
    %12 = vector.load %arg2[%c0_8, %c0_9] : memref<1x1024xf32, #tpu.memory_space<vmem>>, vector<1x512xf32>
    %13 = vector.broadcast %12 : vector<1x512xf32> to vector<8x512xf32>
    %14 = arith.mulf %11, %13 : vector<8x512xf32>
    %c0_10 = arith.constant 0 : index
    %c0_11 = arith.constant 0 : index
    %15 = vector.load %arg14[%c0_10, %c0_11] : memref<8x1024xf32, #tpu.memory_space<vmem>>, vector<8x512xf32>
    tpu.vector_store %arg14[%c0_10, %c0_11], %14 {strides = array<i32>} : memref<8x1024xf32, #tpu.memory_space<vmem>>, vector<8x512xf32>,
    %cst_12 = arith.constant 0.000000e+00 : f32
    %16 = vector.broadcast %cst_12 : f32 to vector<8x512xf32>
    %c0_13 = arith.constant 0 : index
    %c0_14 = arith.constant 0 : index
    %17 = vector.load %arg15[%c0_13, %c0_14] : memref<8x1024xf32, #tpu.memory_space<vmem>>, vector<8x512xf32>
    tpu.vector_store %arg15[%c0_13, %c0_14], %16 {strides = array<i32>} : memref<8x1024xf32, #tpu.memory_space<vmem>>, vector<8x512xf32>,
    %c0_15 = arith.constant 0 : index
    %c0_16 = arith.constant 0 : index
    %c512 = arith.constant 512 : index
    %18 = vector.load %arg1[%c0_15, %c0_16, %c512] : memref<1x8x1024xf32, #tpu.memory_space<vmem>>, vector<1x8x512xf32>
    %19 = vector.shape_cast %18 : vector<1x8x512xf32> to vector<8x512xf32>
    %cst_17 = arith.constant dense<0.000000e+00> : vector<8x512xf32>
    %20 = tpu.matmul %0, %19, %cst_17 {dimension_numbers = #tpu.dot_dimension_numbers<[1], [0], [0], [1], [0, 0, 1, 1], [], []>} : vector<8x8xf32>, vector<8x512xf32>, vector<8x512xf32> -> vector<8x512xf32>
    %21 = vector.broadcast %1 : vector<8x1xf32> to vector<8x512xf32>
    %22 = arith.addf %20, %21 : vector<8x512xf32>
    %cst_18 = arith.constant 0.000000e+00 : f32
    %23 = vector.broadcast %cst_18 : f32 to vector<8x512xf32>
    %24 = arith.cmpf oge, %22, %23 : vector<8x512xf32>
    %cst_19 = arith.constant 0.00999999977 : f32
    %25 = vector.broadcast %cst_19 : f32 to vector<8x512xf32>
    %26 = arith.mulf %25, %22 : vector<8x512xf32>
    %27 = arith.select %24, %22, %26 : vector<8x512xi1>, vector<8x512xf32>
    %c0_20 = arith.constant 0 : index
    %c512_21 = arith.constant 512 : index
    %28 = vector.load %arg2[%c0_20, %c512_21] : memref<1x1024xf32, #tpu.memory_space<vmem>>, vector<1x512xf32>
    %29 = vector.broadcast %28 : vector<1x512xf32> to vector<8x512xf32>
    %30 = arith.mulf %27, %29 : vector<8x512xf32>
    %c0_22 = arith.constant 0 : index
    %c512_23 = arith.constant 512 : index
    %31 = vector.load %arg14[%c0_22, %c512_23] : memref<8x1024xf32, #tpu.memory_space<vmem>>, vector<8x512xf32>
    tpu.vector_store %arg14[%c0_22, %c512_23], %30 {strides = array<i32>} : memref<8x1024xf32, #tpu.memory_space<vmem>>, vector<8x512xf32>,
    %cst_24 = arith.constant 0.000000e+00 : f32
    %32 = vector.broadcast %cst_24 : f32 to vector<8x512xf32>
    %c0_25 = arith.constant 0 : index
    %c512_26 = arith.constant 512 : index
    %33 = vector.load %arg15[%c0_25, %c512_26] : memref<8x1024xf32, #tpu.memory_space<vmem>>, vector<8x512xf32>
    tpu.vector_store %arg15[%c0_25, %c512_26], %32 {strides = array<i32>} : memref<8x1024xf32, #tpu.memory_space<vmem>>, vector<8x512xf32>,
    %c0_27 = arith.constant 0 : index
    %c0_28 = arith.constant 0 : index
    %34 = vector.load %arg6[%c0_27, %c0_28] : memref<8x1xf32, #tpu.memory_space<vmem>>, vector<8x1xf32>
    %c0_29 = arith.constant 0 : index
    %c0_30 = arith.constant 0 : index
    %35 = vector.load %arg7[%c0_29, %c0_30] : memref<8x1xf32, #tpu.memory_space<vmem>>, vector<8x1xf32>
    %c0_31 = arith.constant 0 : index
    %c0_32 = arith.constant 0 : index
    %36 = vector.load %arg8[%c0_31, %c0_32] : memref<8x1xf32, #tpu.memory_space<vmem>>, vector<8x1xf32>
    %cst_33 = arith.constant 0.000000e+00 : f32
    %37 = vector.broadcast %cst_33 : f32 to vector<8x512xf32>
    %c0_34 = arith.constant 0 : index
    %c0_35 = arith.constant 0 : index
    %c0_36 = arith.constant 0 : index
    %38 = vector.load %arg5[%c0_34, %c0_35, %c0_36] : memref<9x8x8xf32, #tpu.memory_space<vmem>>, vector<1x8x8xf32>
    %39 = vector.shape_cast %38 : vector<1x8x8xf32> to vector<8x8xf32>
    %c0_37 = arith.constant 0 : index
    %c107 = arith.constant 107 : index
    %40 = vector.load %arg14[%c0_37, %c107] : memref<8x1024xf32, #tpu.memory_space<vmem>>, vector<8x512xf32>
    %cst_38 = arith.constant dense<0.000000e+00> : vector<8x512xf32>
    %41 = tpu.matmul %39, %40, %cst_38 {dimension_numbers = #tpu.dot_dimension_numbers<[1], [0], [0], [1], [0, 0, 1, 1], [], []>} : vector<8x8xf32>, vector<8x512xf32>, vector<8x512xf32> -> vector<8x512xf32>
    %42 = arith.addf %37, %41 : vector<8x512xf32>
    %c1 = arith.constant 1 : index
    %c0_39 = arith.constant 0 : index
    %c0_40 = arith.constant 0 : index
    %43 = vector.load %arg5[%c1, %c0_39, %c0_40] : memref<9x8x8xf32, #tpu.memory_space<vmem>>, vector<1x8x8xf32>
    %44 = vector.shape_cast %43 : vector<1x8x8xf32> to vector<8x8xf32>
    %c0_41 = arith.constant 0 : index
    %c108 = arith.constant 108 : index
    %45 = vector.load %arg14[%c0_41, %c108] : memref<8x1024xf32, #tpu.memory_space<vmem>>, vector<8x512xf32>
    %cst_42 = arith.constant dense<0.000000e+00> : vector<8x512xf32>
    %46 = tpu.matmul %44, %45, %cst_42 {dimension_numbers = #tpu.dot_dimension_numbers<[1], [0], [0], [1], [0, 0, 1, 1], [], []>} : vector<8x8xf32>, vector<8x512xf32>, vector<8x512xf32> -> vector<8x512xf32>
    %47 = arith.addf %42, %46 : vector<8x512xf32>
    %c2 = arith.constant 2 : index
    %c0_43 = arith.constant 0 : index
    %c0_44 = arith.constant 0 : index
    %48 = vector.load %arg5[%c2, %c0_43, %c0_44] : memref<9x8x8xf32, #tpu.memory_space<vmem>>, vector<1x8x8xf32>
    %49 = vector.shape_cast %48 : vector<1x8x8xf32> to vector<8x8xf32>
    %c0_45 = arith.constant 0 : index
    %c109 = arith.constant 109 : index
    %50 = vector.load %arg14[%c0_45, %c109] : memref<8x1024xf32, #tpu.memory_space<vmem>>, vector<8x512xf32>
    %cst_46 = arith.constant dense<0.000000e+00> : vector<8x512xf32>
    %51 = tpu.matmul %49, %50, %cst_46 {dimension_numbers = #tpu.dot_dimension_numbers<[1], [0], [0], [1], [0, 0, 1, 1], [], []>} : vector<8x8xf32>, vector<8x512xf32>, vector<8x512xf32> -> vector<8x512xf32>
    %52 = arith.addf %47, %51 : vector<8x512xf32>
    %c3 = arith.constant 3 : index
    %c0_47 = arith.constant 0 : index
    %c0_48 = arith.constant 0 : index
    %53 = vector.load %arg5[%c3, %c0_47, %c0_48] : memref<9x8x8xf32, #tpu.memory_space<vmem>>, vector<1x8x8xf32>
    %54 = vector.shape_cast %53 : vector<1x8x8xf32> to vector<8x8xf32>
    %c0_49 = arith.constant 0 : index
    %c127 = arith.constant 127 : index
    %55 = vector.load %arg14[%c0_49, %c127] : memref<8x1024xf32, #tpu.memory_space<vmem>>, vector<8x512xf32>
    %cst_50 = arith.constant dense<0.000000e+00> : vector<8x512xf32>
    %56 = tpu.matmul %54, %55, %cst_50 {dimension_numbers = #tpu.dot_dimension_numbers<[1], [0], [0], [1], [0, 0, 1, 1], [], []>} : vector<8x8xf32>, vector<8x512xf32>, vector<8x512xf32> -> vector<8x512xf32>
    %57 = arith.addf %52, %56 : vector<8x512xf32>
    %c4 = arith.constant 4 : index
    %c0_51 = arith.constant 0 : index
    %c0_52 = arith.constant 0 : index
    %58 = vector.load %arg5[%c4, %c0_51, %c0_52] : memref<9x8x8xf32, #tpu.memory_space<vmem>>, vector<1x8x8xf32>
    %59 = vector.shape_cast %58 : vector<1x8x8xf32> to vector<8x8xf32>
    %c0_53 = arith.constant 0 : index
    %c128 = arith.constant 128 : index
    %60 = vector.load %arg14[%c0_53, %c128] : memref<8x1024xf32, #tpu.memory_space<vmem>>, vector<8x512xf32>
    %cst_54 = arith.constant dense<0.000000e+00> : vector<8x512xf32>
    %61 = tpu.matmul %59, %60, %cst_54 {dimension_numbers = #tpu.dot_dimension_numbers<[1], [0], [0], [1], [0, 0, 1, 1], [], []>} : vector<8x8xf32>, vector<8x512xf32>, vector<8x512xf32> -> vector<8x512xf32>
    %62 = arith.addf %57, %61 : vector<8x512xf32>
    %c5 = arith.constant 5 : index
    %c0_55 = arith.constant 0 : index
    %c0_56 = arith.constant 0 : index
    %63 = vector.load %arg5[%c5, %c0_55, %c0_56] : memref<9x8x8xf32, #tpu.memory_space<vmem>>, vector<1x8x8xf32>
    %64 = vector.shape_cast %63 : vector<1x8x8xf32> to vector<8x8xf32>
    %c0_57 = arith.constant 0 : index
    %c129 = arith.constant 129 : index
    %65 = vector.load %arg14[%c0_57, %c129] : memref<8x1024xf32, #tpu.memory_space<vmem>>, vector<8x512xf32>
    %cst_58 = arith.constant dense<0.000000e+00> : vector<8x512xf32>
    %66 = tpu.matmul %64, %65, %cst_58 {dimension_numbers = #tpu.dot_dimension_numbers<[1], [0], [0], [1], [0, 0, 1, 1], [], []>} : vector<8x8xf32>, vector<8x512xf32>, vector<8x512xf32> -> vector<8x512xf32>
    %67 = arith.addf %62, %66 : vector<8x512xf32>
    %c6 = arith.constant 6 : index
    %c0_59 = arith.constant 0 : index
    %c0_60 = arith.constant 0 : index
    %68 = vector.load %arg5[%c6, %c0_59, %c0_60] : memref<9x8x8xf32, #tpu.memory_space<vmem>>, vector<1x8x8xf32>
    %69 = vector.shape_cast %68 : vector<1x8x8xf32> to vector<8x8xf32>
    %c0_61 = arith.constant 0 : index
    %c147 = arith.constant 147 : index
    %70 = vector.load %arg14[%c0_61, %c147] : memref<8x1024xf32, #tpu.memory_space<vmem>>, vector<8x512xf32>
    %cst_62 = arith.constant dense<0.000000e+00> : vector<8x512xf32>
    %71 = tpu.matmul %69, %70, %cst_62 {dimension_numbers = #tpu.dot_dimension_numbers<[1], [0], [0], [1], [0, 0, 1, 1], [], []>} : vector<8x8xf32>, vector<8x512xf32>, vector<8x512xf32> -> vector<8x512xf32>
    %72 = arith.addf %67, %71 : vector<8x512xf32>
    %c7 = arith.constant 7 : index
    %c0_63 = arith.constant 0 : index
    %c0_64 = arith.constant 0 : index
    %73 = vector.load %arg5[%c7, %c0_63, %c0_64] : memref<9x8x8xf32, #tpu.memory_space<vmem>>, vector<1x8x8xf32>
    %74 = vector.shape_cast %73 : vector<1x8x8xf32> to vector<8x8xf32>
    %c0_65 = arith.constant 0 : index
    %c148 = arith.constant 148 : index
    %75 = vector.load %arg14[%c0_65, %c148] : memref<8x1024xf32, #tpu.memory_space<vmem>>, vector<8x512xf32>
    %cst_66 = arith.constant dense<0.000000e+00> : vector<8x512xf32>
    %76 = tpu.matmul %74, %75, %cst_66 {dimension_numbers = #tpu.dot_dimension_numbers<[1], [0], [0], [1], [0, 0, 1, 1], [], []>} : vector<8x8xf32>, vector<8x512xf32>, vector<8x512xf32> -> vector<8x512xf32>
    %77 = arith.addf %72, %76 : vector<8x512xf32>
    %c8 = arith.constant 8 : index
    %c0_67 = arith.constant 0 : index
    %c0_68 = arith.constant 0 : index
    %78 = vector.load %arg5[%c8, %c0_67, %c0_68] : memref<9x8x8xf32, #tpu.memory_space<vmem>>, vector<1x8x8xf32>
    %79 = vector.shape_cast %78 : vector<1x8x8xf32> to vector<8x8xf32>
    %c0_69 = arith.constant 0 : index
    %c149 = arith.constant 149 : index
    %80 = vector.load %arg14[%c0_69, %c149] : memref<8x1024xf32, #tpu.memory_space<vmem>>, vector<8x512xf32>
    %cst_70 = arith.constant dense<0.000000e+00> : vector<8x512xf32>
    %81 = tpu.matmul %79, %80, %cst_70 {dimension_numbers = #tpu.dot_dimension_numbers<[1], [0], [0], [1], [0, 0, 1, 1], [], []>} : vector<8x8xf32>, vector<8x512xf32>, vector<8x512xf32> -> vector<8x512xf32>
    %82 = arith.addf %77, %81 : vector<8x512xf32>
    %83 = vector.broadcast %34 : vector<8x1xf32> to vector<8x512xf32>
    %84 = arith.addf %82, %83 : vector<8x512xf32>
    %cst_71 = arith.constant 0.000000e+00 : f32
    %85 = vector.broadcast %cst_71 : f32 to vector<8x512xf32>
    %86 = arith.cmpf oge, %84, %85 : vector<8x512xf32>
    %cst_72 = arith.constant 0.00999999977 : f32
    %87 = vector.broadcast %cst_72 : f32 to vector<8x512xf32>
    %88 = arith.mulf %87, %84 : vector<8x512xf32>
    %89 = arith.select %86, %84, %88 : vector<8x512xi1>, vector<8x512xf32>
    %90 = vector.broadcast %35 : vector<8x1xf32> to vector<8x512xf32>
    %91 = arith.mulf %89, %90 : vector<8x512xf32>
    %92 = vector.broadcast %36 : vector<8x1xf32> to vector<8x512xf32>
    %93 = arith.addf %91, %92 : vector<8x512xf32>
    %c0_73 = arith.constant 0 : index
    %c128_74 = arith.constant 128 : index
    %94 = vector.load %arg2[%c0_73, %c128_74] : memref<1x1024xf32, #tpu.memory_space<vmem>>, vector<1x512xf32>
    %95 = vector.broadcast %94 : vector<1x512xf32> to vector<8x512xf32>
    %96 = arith.mulf %93, %95 : vector<8x512xf32>
    %c0_75 = arith.constant 0 : index
    %c128_76 = arith.constant 128 : index
    %97 = vector.load %arg15[%c0_75, %c128_76] : memref<8x1024xf32, #tpu.memory_space<vmem>>, vector<8x512xf32>
    tpu.vector_store %arg15[%c0_75, %c128_76], %96 {strides = array<i32>} : memref<8x1024xf32, #tpu.memory_space<vmem>>, vector<8x512xf32>,
    %c0_77 = arith.constant 0 : index
    %c0_78 = arith.constant 0 : index
    %98 = vector.load %arg10[%c0_77, %c0_78] : memref<8x1xf32, #tpu.memory_space<vmem>>, vector<8x1xf32>
    %c0_79 = arith.constant 0 : index
    %c0_80 = arith.constant 0 : index
    %99 = vector.load %arg11[%c0_79, %c0_80] : memref<8x1xf32, #tpu.memory_space<vmem>>, vector<8x1xf32>
    %c0_81 = arith.constant 0 : index
    %c0_82 = arith.constant 0 : index
    %100 = vector.load %arg12[%c0_81, %c0_82] : memref<8x1xf32, #tpu.memory_space<vmem>>, vector<8x1xf32>
    %cst_83 = arith.constant 0.000000e+00 : f32
    %101 = vector.broadcast %cst_83 : f32 to vector<8x512xf32>
    %c0_84 = arith.constant 0 : index
    %c0_85 = arith.constant 0 : index
    %c0_86 = arith.constant 0 : index
    %102 = vector.load %arg9[%c0_84, %c0_85, %c0_86] : memref<9x8x8xf32, #tpu.memory_space<vmem>>, vector<1x8x8xf32>
    %103 = vector.shape_cast %102 : vector<1x8x8xf32> to vector<8x8xf32>
    %c0_87 = arith.constant 0 : index
    %c86 = arith.constant 86 : index
    %104 = vector.load %arg15[%c0_87, %c86] : memref<8x1024xf32, #tpu.memory_space<vmem>>, vector<8x512xf32>
    %cst_88 = arith.constant dense<0.000000e+00> : vector<8x512xf32>
    %105 = tpu.matmul %103, %104, %cst_88 {dimension_numbers = #tpu.dot_dimension_numbers<[1], [0], [0], [1], [0, 0, 1, 1], [], []>} : vector<8x8xf32>, vector<8x512xf32>, vector<8x512xf32> -> vector<8x512xf32>
    %106 = arith.addf %101, %105 : vector<8x512xf32>
    %c1_89 = arith.constant 1 : index
    %c0_90 = arith.constant 0 : index
    %c0_91 = arith.constant 0 : index
    %107 = vector.load %arg9[%c1_89, %c0_90, %c0_91] : memref<9x8x8xf32, #tpu.memory_space<vmem>>, vector<1x8x8xf32>
    %108 = vector.shape_cast %107 : vector<1x8x8xf32> to vector<8x8xf32>
    %c0_92 = arith.constant 0 : index
    %c88 = arith.constant 88 : index
    %109 = vector.load %arg15[%c0_92, %c88] : memref<8x1024xf32, #tpu.memory_space<vmem>>, vector<8x512xf32>
    %cst_93 = arith.constant dense<0.000000e+00> : vector<8x512xf32>
    %110 = tpu.matmul %108, %109, %cst_93 {dimension_numbers = #tpu.dot_dimension_numbers<[1], [0], [0], [1], [0, 0, 1, 1], [], []>} : vector<8x8xf32>, vector<8x512xf32>, vector<8x512xf32> -> vector<8x512xf32>
    %111 = arith.addf %106, %110 : vector<8x512xf32>
    %c2_94 = arith.constant 2 : index
    %c0_95 = arith.constant 0 : index
    %c0_96 = arith.constant 0 : index
    %112 = vector.load %arg9[%c2_94, %c0_95, %c0_96] : memref<9x8x8xf32, #tpu.memory_space<vmem>>, vector<1x8x8xf32>
    %113 = vector.shape_cast %112 : vector<1x8x8xf32> to vector<8x8xf32>
    %c0_97 = arith.constant 0 : index
    %c90 = arith.constant 90 : index
    %114 = vector.load %arg15[%c0_97, %c90] : memref<8x1024xf32, #tpu.memory_space<vmem>>, vector<8x512xf32>
    %cst_98 = arith.constant dense<0.000000e+00> : vector<8x512xf32>
    %115 = tpu.matmul %113, %114, %cst_98 {dimension_numbers = #tpu.dot_dimension_numbers<[1], [0], [0], [1], [0, 0, 1, 1], [], []>} : vector<8x8xf32>, vector<8x512xf32>, vector<8x512xf32> -> vector<8x512xf32>
    %116 = arith.addf %111, %115 : vector<8x512xf32>
    %c3_99 = arith.constant 3 : index
    %c0_100 = arith.constant 0 : index
    %c0_101 = arith.constant 0 : index
    %117 = vector.load %arg9[%c3_99, %c0_100, %c0_101] : memref<9x8x8xf32, #tpu.memory_space<vmem>>, vector<1x8x8xf32>
    %118 = vector.shape_cast %117 : vector<1x8x8xf32> to vector<8x8xf32>
    %c0_102 = arith.constant 0 : index
    %c126 = arith.constant 126 : index
    %119 = vector.load %arg15[%c0_102, %c126] : memref<8x1024xf32, #tpu.memory_space<vmem>>, vector<8x512xf32>
    %cst_103 = arith.constant dense<0.000000e+00> : vector<8x512xf32>
    %120 = tpu.matmul %118, %119, %cst_103 {dimension_numbers = #tpu.dot_dimension_numbers<[1], [0], [0], [1], [0, 0, 1, 1], [], []>} : vector<8x8xf32>, vector<8x512xf32>, vector<8x512xf32> -> vector<8x512xf32>
    %121 = arith.addf %116, %120 : vector<8x512xf32>
    %c4_104 = arith.constant 4 : index
    %c0_105 = arith.constant 0 : index
    %c0_106 = arith.constant 0 : index
    %122 = vector.load %arg9[%c4_104, %c0_105, %c0_106] : memref<9x8x8xf32, #tpu.memory_space<vmem>>, vector<1x8x8xf32>
    %123 = vector.shape_cast %122 : vector<1x8x8xf32> to vector<8x8xf32>
    %c0_107 = arith.constant 0 : index
    %c128_108 = arith.constant 128 : index
    %124 = vector.load %arg15[%c0_107, %c128_108] : memref<8x1024xf32, #tpu.memory_space<vmem>>, vector<8x512xf32>
    %cst_109 = arith.constant dense<0.000000e+00> : vector<8x512xf32>
    %125 = tpu.matmul %123, %124, %cst_109 {dimension_numbers = #tpu.dot_dimension_numbers<[1], [0], [0], [1], [0, 0, 1, 1], [], []>} : vector<8x8xf32>, vector<8x512xf32>, vector<8x512xf32> -> vector<8x512xf32>
    %126 = arith.addf %121, %125 : vector<8x512xf32>
    %c5_110 = arith.constant 5 : index
    %c0_111 = arith.constant 0 : index
    %c0_112 = arith.constant 0 : index
    %127 = vector.load %arg9[%c5_110, %c0_111, %c0_112] : memref<9x8x8xf32, #tpu.memory_space<vmem>>, vector<1x8x8xf32>
    %128 = vector.shape_cast %127 : vector<1x8x8xf32> to vector<8x8xf32>
    %c0_113 = arith.constant 0 : index
    %c130 = arith.constant 130 : index
    %129 = vector.load %arg15[%c0_113, %c130] : memref<8x1024xf32, #tpu.memory_space<vmem>>, vector<8x512xf32>
    %cst_114 = arith.constant dense<0.000000e+00> : vector<8x512xf32>
    %130 = tpu.matmul %128, %129, %cst_114 {dimension_numbers = #tpu.dot_dimension_numbers<[1], [0], [0], [1], [0, 0, 1, 1], [], []>} : vector<8x8xf32>, vector<8x512xf32>, vector<8x512xf32> -> vector<8x512xf32>
    %131 = arith.addf %126, %130 : vector<8x512xf32>
    %c6_115 = arith.constant 6 : index
    %c0_116 = arith.constant 0 : index
    %c0_117 = arith.constant 0 : index
    %132 = vector.load %arg9[%c6_115, %c0_116, %c0_117] : memref<9x8x8xf32, #tpu.memory_space<vmem>>, vector<1x8x8xf32>
    %133 = vector.shape_cast %132 : vector<1x8x8xf32> to vector<8x8xf32>
    %c0_118 = arith.constant 0 : index
    %c166 = arith.constant 166 : index
    %134 = vector.load %arg15[%c0_118, %c166] : memref<8x1024xf32, #tpu.memory_space<vmem>>, vector<8x512xf32>
    %cst_119 = arith.constant dense<0.000000e+00> : vector<8x512xf32>
    %135 = tpu.matmul %133, %134, %cst_119 {dimension_numbers = #tpu.dot_dimension_numbers<[1], [0], [0], [1], [0, 0, 1, 1], [], []>} : vector<8x8xf32>, vector<8x512xf32>, vector<8x512xf32> -> vector<8x512xf32>
    %136 = arith.addf %131, %135 : vector<8x512xf32>
    %c7_120 = arith.constant 7 : index
    %c0_121 = arith.constant 0 : index
    %c0_122 = arith.constant 0 : index
    %137 = vector.load %arg9[%c7_120, %c0_121, %c0_122] : memref<9x8x8xf32, #tpu.memory_space<vmem>>, vector<1x8x8xf32>
    %138 = vector.shape_cast %137 : vector<1x8x8xf32> to vector<8x8xf32>
    %c0_123 = arith.constant 0 : index
    %c168 = arith.constant 168 : index
    %139 = vector.load %arg15[%c0_123, %c168] : memref<8x1024xf32, #tpu.memory_space<vmem>>, vector<8x512xf32>
    %cst_124 = arith.constant dense<0.000000e+00> : vector<8x512xf32>
    %140 = tpu.matmul %138, %139, %cst_124 {dimension_numbers = #tpu.dot_dimension_numbers<[1], [0], [0], [1], [0, 0, 1, 1], [], []>} : vector<8x8xf32>, vector<8x512xf32>, vector<8x512xf32> -> vector<8x512xf32>
    %141 = arith.addf %136, %140 : vector<8x512xf32>
    %c8_125 = arith.constant 8 : index
    %c0_126 = arith.constant 0 : index
    %c0_127 = arith.constant 0 : index
    %142 = vector.load %arg9[%c8_125, %c0_126, %c0_127] : memref<9x8x8xf32, #tpu.memory_space<vmem>>, vector<1x8x8xf32>
    %143 = vector.shape_cast %142 : vector<1x8x8xf32> to vector<8x8xf32>
    %c0_128 = arith.constant 0 : index
    %c170 = arith.constant 170 : index
    %144 = vector.load %arg15[%c0_128, %c170] : memref<8x1024xf32, #tpu.memory_space<vmem>>, vector<8x512xf32>
    %cst_129 = arith.constant dense<0.000000e+00> : vector<8x512xf32>
    %145 = tpu.matmul %143, %144, %cst_129 {dimension_numbers = #tpu.dot_dimension_numbers<[1], [0], [0], [1], [0, 0, 1, 1], [], []>} : vector<8x8xf32>, vector<8x512xf32>, vector<8x512xf32> -> vector<8x512xf32>
    %146 = arith.addf %141, %145 : vector<8x512xf32>
    %147 = vector.broadcast %98 : vector<8x1xf32> to vector<8x512xf32>
    %148 = arith.addf %146, %147 : vector<8x512xf32>
    %cst_130 = arith.constant 0.000000e+00 : f32
    %149 = vector.broadcast %cst_130 : f32 to vector<8x512xf32>
    %150 = arith.cmpf oge, %148, %149 : vector<8x512xf32>
    %cst_131 = arith.constant 0.00999999977 : f32
    %151 = vector.broadcast %cst_131 : f32 to vector<8x512xf32>
    %152 = arith.mulf %151, %148 : vector<8x512xf32>
    %153 = arith.select %150, %148, %152 : vector<8x512xi1>, vector<8x512xf32>
    %154 = vector.broadcast %99 : vector<8x1xf32> to vector<8x512xf32>
    %155 = arith.mulf %153, %154 : vector<8x512xf32>
    %156 = vector.broadcast %100 : vector<8x1xf32> to vector<8x512xf32>
    %157 = arith.addf %155, %156 : vector<8x512xf32>
    %c0_132 = arith.constant 0 : index
    %c128_133 = arith.constant 128 : index
    %158 = vector.load %arg14[%c0_132, %c128_133] : memref<8x1024xf32, #tpu.memory_space<vmem>>, vector<8x512xf32>
    %159 = arith.addf %158, %157 : vector<8x512xf32>
    %c0_134 = arith.constant 0 : index
    %c0_135 = arith.constant 0 : index
    %c0_136 = arith.constant 0 : index
    %160 = vector.load %arg13[%c0_134, %c0_135, %c0_136] : memref<1x8x512xf32, #tpu.memory_space<vmem>>, vector<1x8x512xf32>
    %161 = vector.shape_cast %160 : vector<1x8x512xf32> to vector<8x512xf32>
    %162 = vector.shape_cast %159 : vector<8x512xf32> to vector<1x8x512xf32>
    tpu.vector_store %arg13[%c0_134, %c0_135, %c0_136], %162 {strides = array<i32>} : memref<1x8x512xf32, #tpu.memory_space<vmem>>, vector<1x8x512xf32>,
    return
  }
  func.func @transform_0(%arg0: i32) -> (i32, i32, i32) {
    %c0_i32 = arith.constant 0 : i32
    %c0_i32_0 = arith.constant 0 : i32
    %c0_i32_1 = arith.constant 0 : i32
    return %arg0, %c0_i32, %c0_i32_0 : i32, i32, i32
  }
  func.func @transform_1(%arg0: i32) -> (i32, i32) {
    %c0_i32 = arith.constant 0 : i32
    %c0_i32_0 = arith.constant 0 : i32
    %c0_i32_1 = arith.constant 0 : i32
    return %c0_i32, %c0_i32_0 : i32, i32
  }
  func.func @transform_2(%arg0: i32) -> (i32, i32) {
    %c0_i32 = arith.constant 0 : i32
    %c0_i32_0 = arith.constant 0 : i32
    %c0_i32_1 = arith.constant 0 : i32
    return %c0_i32, %c0_i32_0 : i32, i32
  }
  func.func @transform_3(%arg0: i32) -> (i32, i32) {
    %c0_i32 = arith.constant 0 : i32
    %c0_i32_0 = arith.constant 0 : i32
    %c0_i32_1 = arith.constant 0 : i32
    return %c0_i32, %c0_i32_0 : i32, i32
  }
  func.func @transform_4(%arg0: i32) -> (i32, i32, i32) {
    %c0_i32 = arith.constant 0 : i32
    %c0_i32_0 = arith.constant 0 : i32
    %c0_i32_1 = arith.constant 0 : i32
    %c0_i32_2 = arith.constant 0 : i32
    return %c0_i32, %c0_i32_0, %c0_i32_1 : i32, i32, i32
  }
  func.func @transform_5(%arg0: i32) -> (i32, i32) {
    %c0_i32 = arith.constant 0 : i32
    %c0_i32_0 = arith.constant 0 : i32
    %c0_i32_1 = arith.constant 0 : i32
    return %c0_i32, %c0_i32_0 : i32, i32
  }
  func.func @transform_6(%arg0: i32) -> (i32, i32) {
    %c0_i32 = arith.constant 0 : i32
    %c0_i32_0 = arith.constant 0 : i32
    %c0_i32_1 = arith.constant 0 : i32
    return %c0_i32, %c0_i32_0 : i32, i32
  }
  func.func @transform_7(%arg0: i32) -> (i32, i32) {
    %c0_i32 = arith.constant 0 : i32
    %c0_i32_0 = arith.constant 0 : i32
    %c0_i32_1 = arith.constant 0 : i32
    return %c0_i32, %c0_i32_0 : i32, i32
  }
  func.func @transform_8(%arg0: i32) -> (i32, i32, i32) {
    %c0_i32 = arith.constant 0 : i32
    %c0_i32_0 = arith.constant 0 : i32
    %c0_i32_1 = arith.constant 0 : i32
    %c0_i32_2 = arith.constant 0 : i32
    return %c0_i32, %c0_i32_0, %c0_i32_1 : i32, i32, i32
  }
  func.func @transform_9(%arg0: i32) -> (i32, i32) {
    %c0_i32 = arith.constant 0 : i32
    %c0_i32_0 = arith.constant 0 : i32
    %c0_i32_1 = arith.constant 0 : i32
    return %c0_i32, %c0_i32_0 : i32, i32
  }
  func.func @transform_10(%arg0: i32) -> (i32, i32) {
    %c0_i32 = arith.constant 0 : i32
    %c0_i32_0 = arith.constant 0 : i32
    %c0_i32_1 = arith.constant 0 : i32
    return %c0_i32, %c0_i32_0 : i32, i32
  }
  func.func @transform_11(%arg0: i32) -> (i32, i32) {
    %c0_i32 = arith.constant 0 : i32
    %c0_i32_0 = arith.constant 0 : i32
    %c0_i32_1 = arith.constant 0 : i32
    return %c0_i32, %c0_i32_0 : i32, i32
  }
  func.func @transform_12(%arg0: i32) -> (i32, i32, i32) {
    %c0_i32 = arith.constant 0 : i32
    %c0_i32_0 = arith.constant 0 : i32
    %c0_i32_1 = arith.constant 0 : i32
    return %arg0, %c0_i32, %c0_i32_0 : i32, i32, i32
  }
}

</mosaic_0001>

<bundles_post_ra>
// kernel: res_context_block.1
= control target key start
LH: loop header
LB: loop body
LE: loop exit
PB: predicated region body
PF: predicated region fallthrough
CT: control target
= control target key end

     0   :  { %s3142_s21 = smov 0   ;;  %s3535_s0 = inlined_call_operand.vmem [shape: f32[2,8,1024], index: 0, kind: input, shape index: {}]   ;;  %s3536_s1 = inlined_call_operand.vmem [shape: f32[1,1024], index: 1, kind: input, shape index: {}]   ;;  %s3537_s2 = inlined_call_operand.vmem [shape: f32[8,8], index: 2, kind: input, shape index: {}]   ;;  %s3538_s3 = inlined_call_operand.vmem [shape: f32[8,1], index: 3, kind: input, shape index: {}]   ;;  %s3539_s4 = inlined_call_operand.vmem [shape: f32[9,8,8], index: 4, kind: input, shape index: {}]   ;;  %s3540_s5 = inlined_call_operand.vmem [shape: f32[8,1], index: 5, kind: input, shape index: {}]   ;;  %s3541_s6 = inlined_call_operand.vmem [shape: f32[8,1], index: 6, kind: input, shape index: {}]   ;;  %s3542_s7 = inlined_call_operand.vmem [shape: f32[8,1], index: 7, kind: input, shape index: {}]   ;;  %s3543_s8 = inlined_call_operand.vmem [shape: f32[9,8,8], index: 8, kind: input, shape index: {}]   ;;  %s3544_s9 = inlined_call_operand.vmem [shape: f32[8,1], index: 9, kind: input, shape index: {}]   ;;  %s3545_s10 = inlined_call_operand.vmem [shape: f32[8,1], index: 10, kind: input, shape index: {}]   ;;  %s3546_s11 = inlined_call_operand.vmem [shape: f32[8,1], index: 11, kind: input, shape index: {}]   ;;  %s3547_s12 = inlined_call_operand.vmem [shape: f32[2,8,512], index: 12, kind: output, shape index: {}]  }
   0x1 LB: > { %s2758_s22 = sadd.s32 4294967295, %s3057_s21   ;;  %p2762_p0 = scmp.ge.s32.totalorder %s3057_s21, 1  ;;  %s3057_s21 = sphi %s3142_s21, %s22_s21  }
   0x2   : > { %p362_p1 = scmp.lt.s32.totalorder %s3057_s21, 3 }
   0x4   : > { %p363_p2 = pnand %p2762_p0, %p362_p1 }
   0x5   : > { %p404_p3 = scmp.lt.s32.totalorder (!%p363_p2), %s2758_s22, 1  ;;  %s3060_s17 = smov (!%p363_p2), 20  }
   0x6   : > { %366 = sbr.rel (%p363_p2) target bundleno = 821 (0x335), region = 68  ;;  %s3061_s18 = smov (!%p363_p2), 21  }
   0x7   : > { %s3062_s19 = smov (!%p363_p2), 19   ;;  %s3063_s20 = smov (!%p363_p2), 1  }
   0x8   : > { %s3064_s23 = smov (!%p363_p2), 109   ;;  %s3065_s24 = smov (!%p363_p2), 127  }
   0x9   : > { %s3067_s26 = smov (!%p363_p2), 107   ;;  %s3075_s27 = smov (!%p363_p2), 88  }
   0xa   : > { %s3076_s29 = smov (!%p363_p2), 86  }
   0xb   : > { %v415_v0 = vld [vmem:[%s3538_s3] sm:$0xff]  ;;  %v3059_v1 = vmov 0   ;;  %s3549_s22 = smov (!%p404_p3, %s2758_s22), 1  ;;  %vm425_vm0 = vcmask 64512   ;;  %vm687_vm7 = vcmask 162816   ;;  %vm789_vm8 = vcmask 171008  }
   0xc   : > { %2893 = vset.pattern.permute.xlu0 %v3059_v1  ;;  %2970 = vset.pattern.permute.xlu1 %v3059_v1  ;;  %s2865_s25 = sshll.u32 %s3549_s22, 6  ;;  %v3164_v2 = vld [vmem:[%s3537_s2] sm:$0xff]  ;;  %vm893_vm9 = vcmask 154624   ;;  %vm1001_vm10 = vcmask 7168   ;;  %vm1208_vm11 = vcmask 1039360   ;;  %vm1316_vm12 = vcmask 891904  }
   0xd   : > { %422 = vperm.xlu0 %2893, %v415_v0   ;;  %2969 = vset.pattern.permute.xlu2 %v3059_v1  ;;  %s3159_s28 = scalar_lea.vmem %s3535_s0, %s2865_s25  ;;  %v639_v13 = vld [vmem:[%s3536_s1 + $0x4] sm:$0xf]  ;;  %v521_v14 = vld [vmem:[%s3536_s1] sm:$0xf]  ;;  %s3066_s25 = smov 108   ;;  %v2775_v1 = vld [vmem:[%s3539_s4 + $0x8] sm:$0xff] }
   0xe   : > { %v416_v3 = vld [vmem:[%s3159_s28] sm:$0xff]  ;;  %v417_v4 = vld [vmem:[%s3159_s28 + $0x8] sm:$0xff]  ;;  %v418_v5 = vld [vmem:[%s3159_s28 + $0x10] sm:$0xff]  ;;  %v524_v18 = vperm.slane %v521_v14, 1  ;;  %v525_v22 = vperm.slane %v521_v14, 2  ;;  %v526_v23 = vperm.slane %v521_v14, 3 }
   0xf   : > { %444 = vmatpush.msra.mxu0 %v416_v3  ;;  %464 = vmatpush.msra.mxu1 %v417_v4  ;;  %v419_v6 = vld [vmem:[%s3159_s28 + $0x18] sm:$0xff]  ;;  %v543_v7 = vld [vmem:[%s3159_s28 + $0x20] sm:$0xff]  ;;  %v544_v8 = vld [vmem:[%s3159_s28 + $0x28] sm:$0xff]  ;;  %v641_v25 = vperm.slane %v639_v13, 0  ;;  %v523_v41 = vperm.slane %v521_v14, 0  ;;  %v642_v47 = vperm.slane %v639_v13, 1 }
  0x10   : > { %484 = vmatpush.msra.mxu2 %v418_v5  ;;  %504 = vmatpush.msra.mxu3 %v419_v6  ;;  %v662_v52 = vld [vmem:[%s3541_s6] sm:$0xff]  ;;  %v545_v53 = vld [vmem:[%s3159_s28 + $0x30] sm:$0xff]  ;;  %v546_v54 = vld [vmem:[%s3159_s28 + $0x38] sm:$0xff]  ;;  %vm1424_vm13 = vcmask 883712   ;;  %vm1532_vm14 = vcmask 875520  }
  0x11   : > { %2767 = vmatmul.msk.f32.vlgmr.msra.gmra.mxu0 %vm425_vm0, %v3164_v2  ;;  %2768 = vmatmul.msk.f32.vlgmr.msra.gmra.mxu1 %vm425_vm0, %v3164_v2 }
  0x12   : > { %2769 = vmatmul.msk.f32.vlgmr.msra.gmra.mxu2 %vm425_vm0, %v3164_v2  ;;  %2770 = vmatmul.msk.f32.vlgmr.msra.gmra.mxu3 %vm425_vm0, %v3164_v2 }
  0x13   : > { %562 = vmatpush.msrb.mxu0 %v543_v7  ;;  %582 = vmatpush.msrb.mxu1 %v544_v8 }
  0x14   : > { %602 = vmatpush.msrb.mxu2 %v545_v53  ;;  %622 = vmatpush.msrb.mxu3 %v546_v54  ;;  %v2794_v54 = vld [vmem:[%s3539_s4 + $0x20] sm:$0xff] }
  0x19   : > { %2771 = vmatmul.msk.f32.vlgmr.msrb.gmra.mxu0 %vm425_vm0, %v3164_v2  ;;  %2772 = vmatmul.msk.f32.vlgmr.msrb.gmra.mxu1 %vm425_vm0, %v3164_v2 }
  0x1a   : > { %2773 = vmatmul.msk.f32.vlgmr.msrb.gmra.mxu2 %vm425_vm0, %v3164_v2  ;;  %2774 = vmatmul.msk.f32.vlgmr.msrb.gmra.mxu3 %vm425_vm0, %v3164_v2 }
  0x7f   : > { %v423_v10 = vpop.permute.xlu0 %422 }
  0x8e   : > { %v446_v9 = vpop.f32.mrf.mxu0  ;;  %v466_v11 = vpop.f32.mrf.mxu1 }
  0x8f   : > { %v467_v12 = vadd.f32 %v466_v11, %v423_v10  ;;  %v447_v32 = vadd.f32 %v446_v9, %v423_v10 }
  0x91   : > { %v514_v15 = vmul.f32 0.01, %v467_v12  ;;  %vm510_vm1 = vcmp.ge.f32.partialorder %v467_v12, 0.0  ;;  %v513_v40 = vmul.f32 0.01, %v447_v32  ;;  %vm509_vm5 = vcmp.ge.f32.partialorder %v447_v32, 0.0 }
  0x93   : > { %v518_v28 = vsel %vm510_vm1, %v467_v12, %v514_v15  ;;  %v517_v42 = vsel %vm509_vm5, %v447_v32, %v513_v40  ;;  %v664_v15 = vld [vmem:[%s3539_s4] sm:$0xff]  ;;  %v2789_v40 = vld [vmem:[%s3539_s4 + $0x18] sm:$0xff]  ;;  %vm1813_vm5 = vcmask 343040  }
  0x94   : > { %v3194_v36 = vmul.f32 %v524_v18, %v518_v28  ;;  %v531_v43 = vmul.f32 %v523_v41, %v517_v42 }
  0x95   : > { %v486_v16 = vpop.f32.mrf.mxu2  ;;  %v506_v17 = vpop.f32.mrf.mxu3 }
  0x96   : > { %v487_v19 = vadd.f32 %v486_v16, %v423_v10  ;;  %v507_v20 = vadd.f32 %v506_v17, %v423_v10  ;;  %v564_v21 = vpop.f32.mrf.mxu0  ;;  %v584_v44 = vpop.f32.mrf.mxu1 }
  0x97   : > { %v565_v24 = vadd.f32 %v564_v21, %v423_v10  ;;  %v585_v45 = vadd.f32 %v584_v44, %v423_v10 }
  0x98   : > { %vm511_vm2 = vcmp.ge.f32.partialorder %v487_v19, 0.0  ;;  %v515_v26 = vmul.f32 0.01, %v487_v19  ;;  %vm512_vm3 = vcmp.ge.f32.partialorder %v507_v20, 0.0  ;;  %v516_v27 = vmul.f32 0.01, %v507_v20 }
  0x99   : > { %vm627_vm4 = vcmp.ge.f32.partialorder %v565_v24, 0.0  ;;  %v631_v29 = vmul.f32 0.01, %v565_v24  ;;  %v632_v46 = vmul.f32 0.01, %v585_v45  ;;  %vm628_vm6 = vcmp.ge.f32.partialorder %v585_v45, 0.0 }
  0x9a   : > { %v519_v30 = vsel %vm511_vm2, %v487_v19, %v515_v26  ;;  %v520_v31 = vsel %vm512_vm3, %v507_v20, %v516_v27  ;;  %v2784_v27 = vld [vmem:[%s3539_s4 + $0x10] sm:$0xff] }
  0x9b   : > { %v3190_v33 = vmul.f32 %v525_v22, %v519_v30  ;;  %v3192_v34 = vmul.f32 %v526_v23, %v520_v31  ;;  %v635_v35 = vsel %vm627_vm4, %v565_v24, %v631_v29  ;;  %v636_v48 = vsel %vm628_vm6, %v585_v45, %v632_v46 }
  0x9c   : > { %v3196_v37 = vmul.f32 %v641_v25, %v635_v35  ;;  %v650_v49 = vmul.f32 %v642_v47, %v636_v48  ;;  %vm1711_vm4 = vcmask 326656   ;;  %vm1917_vm6 = vcmask 310272  }
  0x9d   : > { %v2894_v38 = vpack.i.bf16 %v3192_v34, %v3190_v33 }
  0x9e   : > { %v2909_v39 = vpack.i.bf16 %v3194_v36, %v3196_v37  ;;  %v2944_v50 = vpack.i.bf16 %v3196_v37, %v3192_v34  ;;  %v2939_v51 = vpack.i.bf16 %v3190_v33, %v650_v49 }
  0x9f   : > { %2895 = vrot.lane.b32.xlu0 %v2894_v38, %s3060_s17 }
  0xa0   : > { %2910 = vrot.lane.b32.xlu2 %v2909_v39, %s3061_s18  ;;  %2900 = vrot.lane.b32.xlu1 %v2909_v39, %s3060_s17 }
  0xa7   : > { %2915 = vrot.lane.b32.xlu0 %v2894_v38, %s3062_s19 }
  0xa8   : > { %2905 = vrot.lane.b32.xlu1 %v2894_v38, %s3061_s18  ;;  %677 = vrot.lane.b32.xlu2 %v531_v43, %s3060_s17 }
  0xaf   : > { %2920 = vrot.lane.b32.xlu0 %v2894_v38, %s3063_s20 }
  0xb0   : > { %2925 = vrot.lane.b32.xlu1 %v2909_v39, %s3062_s19  ;;  %779 = vrot.lane.b32.xlu2 %v531_v43, %s3061_s18 }
  0xb7   : > { %991 = vrot.lane.b32.xlu0 %v531_v43, %s3063_s20 }
  0xb8   : > { %2930 = vrot.lane.b32.xlu1 %v2909_v39, %s3063_s20  ;;  %883 = vrot.lane.b32.xlu2 %v531_v43, %s3062_s19  ;;  %s3068_s19 = smov 40   ;;  %s3069_s20 = smov 42  }
  0xbf   : > { %2945 = vrot.lane.b32.xlu0 %v2944_v50, %s3064_s23 }
  0xc0   : > { %2935 = vrot.lane.b32.xlu1 %v2944_v50, %s3065_s24  ;;  %2940 = vrot.lane.b32.xlu2 %v2939_v51, %s3065_s24 }
  0xc7   : > { %2955 = vrot.lane.b32.xlu0 %v2944_v50, %s3066_s25 }
  0xc8   : > { %2950 = vrot.lane.b32.xlu1 %v2939_v51, %s3064_s23  ;;  %1198 = vrot.lane.b32.xlu2 %v3194_v36, %s3065_s24  ;;  %s3071_s24 = smov 2  }
  0xcf   : > { %2965 = vrot.lane.b32.xlu0 %v2944_v50, %s3067_s26 }
  0xd0   : > { %2960 = vrot.lane.b32.xlu1 %v2939_v51, %s3066_s25  ;;  %1306 = vrot.lane.b32.xlu2 %v3194_v36, %s3064_s23  ;;  %s3070_s23 = smov 38  }
  0xd7   : > { %1524 = vrot.lane.b32.xlu0 %v3190_v33, %s3067_s26 }
  0xd8   : > { %1530 = vrot.lane.b32.xlu1 %v650_v49, %s3067_s26  ;;  %1414 = vrot.lane.b32.xlu2 %v3194_v36, %s3066_s25  ;;  %s3072_s25 = smov 126  }
  0xdf   : > { %1651 = vperm.xlu0 %2893, %v662_v52  }
  0xe0   : > { %1522 = vrot.lane.b32.xlu1 %v3194_v36, %s3067_s26  ;;  %s3073_s26 = smov 90  }
  0xfa   : > { %v2911_v55 = vpop.permute.xlu2 %2910 }
  0xfb   : > { %v2913_v5 = vunpack.i.h.bf16 %v2911_v55  ;;  %v2912_v9 = vunpack.i.l.bf16 %v2911_v55 }
 0x102   : > { %v678_v56 = vpop.permute.xlu2 %677 }
 0x10a   : > { %v780_v57 = vpop.permute.xlu2 %779 }
 0x10b   : > { %v790_v6 = vsel %vm789_vm8, %v780_v57, %v2913_v5 }
 0x111   : > { %v2896_v58 = vpop.permute.xlu0 %2895 }
 0x112   : > { %v2898_v59 = vunpack.i.h.bf16 %v2896_v58  ;;  %v2897_v60 = vunpack.i.l.bf16 %v2896_v58  ;;  %v2901_v61 = vpop.permute.xlu1 %2900  ;;  %v884_v10 = vpop.permute.xlu2 %883 }
 0x113   : > { %v2903_v62 = vunpack.i.h.bf16 %v2901_v61  ;;  %v2902_v63 = vunpack.i.l.bf16 %v2901_v61  ;;  %v661_v61 = vld [vmem:[%s3540_s5] sm:$0xff] }
 0x114   : > { %v690_v0 = vsel %vm687_vm7, %v2897_v60, %v2898_v59  ;;  %1630 = vperm.xlu2 %2969, %v661_v61  }
 0x115   : > { %754 = vmatpush.msra.mxu2 %v690_v0  ;;  %v688_v3 = vsel %vm687_vm7, %v678_v56, %v2903_v62  ;;  %v689_v4 = vsel %vm687_vm7, %v2903_v62, %v2897_v60  ;;  %v691_v2 = vsel %vm687_vm7, %v2898_v59, %v2902_v63  ;;  %v663_v60 = vld [vmem:[%s3542_s7] sm:$0xff]  ;;  %vm2025_vm7 = vcmask 15360  }
 0x116   : > { %714 = vmatpush.msra.mxu0 %v688_v3  ;;  %734 = vmatpush.msra.mxu1 %v689_v4 }
 0x117   : > { %774 = vmatpush.msra.mxu3 %v691_v2  ;;  %2776 = vmatmul.msk.f32.vlgmr.msra.gmra.mxu0 %vm425_vm0, %v2775_v1  ;;  %v2799_v2 = vld [vmem:[%s3539_s4 + $0x28] sm:$0xff] }
 0x118   : > { %2777 = vmatmul.msk.f32.vlgmr.msra.gmra.mxu1 %vm425_vm0, %v2775_v1  ;;  %2778 = vmatmul.msk.f32.vlgmr.msra.gmra.mxu2 %vm425_vm0, %v2775_v1 }
 0x119   : > { %2779 = vmatmul.msk.f32.vlgmr.msra.gmra.mxu3 %vm425_vm0, %v2775_v1  ;;  %816 = vmatpush.msrb.mxu0 %v790_v6  ;;  %v2916_v7 = vpop.permute.xlu0 %2915 }
 0x11a   : > { %v2906_v8 = vpop.permute.xlu1 %2905  ;;  %v2918_v13 = vunpack.i.h.bf16 %v2916_v7  ;;  %v2917_v14 = vunpack.i.l.bf16 %v2916_v7  ;;  %v2941_v28 = vpop.permute.xlu2 %2940  ;;  %1660 = vperm.xlu1 %2970, %v663_v60  }
 0x11b   : > { %v2908_v11 = vunpack.i.h.bf16 %v2906_v8  ;;  %v2907_v12 = vunpack.i.l.bf16 %v2906_v8  ;;  %v2943_v45 = vunpack.i.h.bf16 %v2941_v28  ;;  %v2942_v49 = vunpack.i.l.bf16 %v2941_v28  ;;  %v2814_v28 = vld [vmem:[%s3539_s4 + $0x40] sm:$0xff] }
 0x11c   : > { %v896_v19 = vsel %vm893_vm9, %v2917_v14, %v2918_v13 }
 0x11d   : > { %v791_v16 = vsel %vm789_vm8, %v2913_v5, %v2907_v12  ;;  %v792_v17 = vsel %vm789_vm8, %v2907_v12, %v2908_v11  ;;  %v793_v18 = vsel %vm789_vm8, %v2908_v11, %v2912_v9  ;;  %vm2232_vm8 = vcmask 1031168  }
 0x11e   : > { %836 = vmatpush.msrb.mxu1 %v791_v16  ;;  %856 = vmatpush.msrb.mxu2 %v792_v17  ;;  %v2804_v16 = vld [vmem:[%s3539_s4 + $0x30] sm:$0xff] }
 0x11f   : > { %876 = vmatpush.msrb.mxu3 %v793_v18  ;;  %2780 = vmatmul.msk.f32.vlgmr.msrb.gmra.mxu0 %vm425_vm0, %v664_v15 }
 0x120   : > { %2781 = vmatmul.msk.f32.vlgmr.msrb.gmra.mxu1 %vm425_vm0, %v664_v15  ;;  %2782 = vmatmul.msk.f32.vlgmr.msrb.gmra.mxu2 %vm425_vm0, %v664_v15 }
 0x121   : > { %2783 = vmatmul.msk.f32.vlgmr.msrb.gmra.mxu3 %vm425_vm0, %v664_v15  ;;  %960 = vmatpush.msra.mxu2 %v896_v19  ;;  %v2921_v20 = vpop.permute.xlu0 %2920 }
 0x122   : > { %v2923_v21 = vunpack.i.h.bf16 %v2921_v20  ;;  %v2922_v22 = vunpack.i.l.bf16 %v2921_v20  ;;  %v2926_v23 = vpop.permute.xlu1 %2925  ;;  %v1199_v44 = vpop.permute.xlu2 %1198 }
 0x123   : > { %v2928_v24 = vunpack.i.h.bf16 %v2926_v23  ;;  %v2927_v25 = vunpack.i.l.bf16 %v2926_v23  ;;  %v1209_v47 = vsel %vm1208_vm11, %v1199_v44, %v2943_v45 }
 0x124   : > { %v1004_v26 = vsel %vm1001_vm10, %v2922_v22, %v2923_v21 }
 0x125   : > { %1068 = vmatpush.msrb.mxu2 %v1004_v26  ;;  %v894_v29 = vsel %vm893_vm9, %v884_v10, %v2928_v24  ;;  %v895_v30 = vsel %vm893_vm9, %v2928_v24, %v2917_v14  ;;  %v897_v31 = vsel %vm893_vm9, %v2918_v13, %v2927_v25  ;;  %v2809_v25 = vld [vmem:[%s3539_s4 + $0x38] sm:$0xff]  ;;  %vm2340_vm9 = vcmask 736256  }
 0x126   : > { %920 = vmatpush.msra.mxu0 %v894_v29  ;;  %940 = vmatpush.msra.mxu1 %v895_v30  ;;  %v604_v29 = vpop.f32.mrf.mxu2  ;;  %v624_v30 = vpop.f32.mrf.mxu3 }
 0x127   : > { %980 = vmatpush.msra.mxu3 %v897_v31  ;;  %2785 = vmatmul.msk.f32.vlgmr.msra.gmra.mxu0 %vm425_vm0, %v2784_v27 }
 0x128   : > { %2786 = vmatmul.msk.f32.vlgmr.msra.gmra.mxu1 %vm425_vm0, %v2784_v27  ;;  %2787 = vmatmul.msk.f32.vlgmr.msra.gmra.mxu2 %vm425_vm0, %v2784_v27 }
 0x129   : > { %2788 = vmatmul.msk.f32.vlgmr.msra.gmra.mxu3 %vm425_vm0, %v2784_v27  ;;  %1157 = vmatpush.msra.mxu2 %v3192_v34  ;;  %v992_v32 = vpop.permute.xlu0 %991 }
 0x12a   : > { %v2931_v35 = vpop.permute.xlu1 %2930  ;;  %v1307_v62 = vpop.permute.xlu2 %1306 }
 0x12b   : > { %v2933_v38 = vunpack.i.h.bf16 %v2931_v35  ;;  %v2932_v39 = vunpack.i.l.bf16 %v2931_v35 }
 0x12d   : > { %v1002_v41 = vsel %vm1001_vm10, %v992_v32, %v2933_v38  ;;  %v1003_v42 = vsel %vm1001_vm10, %v2933_v38, %v2922_v22  ;;  %v1005_v43 = vsel %vm1001_vm10, %v2923_v21, %v2932_v39  ;;  %vm2448_vm10 = vcmask 719872  }
 0x12e   : > { %1028 = vmatpush.msrb.mxu0 %v1002_v41  ;;  %1048 = vmatpush.msrb.mxu1 %v1003_v42 }
 0x12f   : > { %1088 = vmatpush.msrb.mxu3 %v1005_v43  ;;  %2790 = vmatmul.msk.f32.vlgmr.msrb.gmra.mxu0 %vm425_vm0, %v2789_v40 }
 0x130   : > { %2791 = vmatmul.msk.f32.vlgmr.msrb.gmra.mxu1 %vm425_vm0, %v2789_v40  ;;  %2792 = vmatmul.msk.f32.vlgmr.msrb.gmra.mxu2 %vm425_vm0, %v2789_v40 }
 0x131   : > { %2793 = vmatmul.msk.f32.vlgmr.msrb.gmra.mxu3 %vm425_vm0, %v2789_v40  ;;  %1117 = vmatpush.msra.mxu0 %v3194_v36  ;;  %v2946_v46 = vpop.permute.xlu0 %2945 }
 0x132   : > { %1137 = vmatpush.msra.mxu1 %v3190_v33  ;;  %1177 = vmatpush.msra.mxu3 %v3196_v37  ;;  %v2936_v48 = vpop.permute.xlu1 %2935  ;;  %v2948_v52 = vunpack.i.h.bf16 %v2946_v46  ;;  %v2947_v53 = vunpack.i.l.bf16 %v2946_v46  ;;  %v1415_v13 = vpop.permute.xlu2 %1414 }
 0x133   : > { %1235 = vmatpush.msrb.mxu0 %v1209_v47  ;;  %v2938_v50 = vunpack.i.h.bf16 %v2936_v48  ;;  %v2937_v51 = vunpack.i.l.bf16 %v2936_v48 }
 0x134   : > { %v1319_v58 = vsel %vm1316_vm12, %v2947_v53, %v2948_v52 }
 0x135   : > { %v1210_v55 = vsel %vm1208_vm11, %v2943_v45, %v2937_v51  ;;  %v1211_v56 = vsel %vm1208_vm11, %v2937_v51, %v2938_v50  ;;  %v1212_v57 = vsel %vm1208_vm11, %v2938_v50, %v2942_v49  ;;  %vm2556_vm11 = vcmask 703488  }
 0x136   : > { %1255 = vmatpush.msrb.mxu1 %v1210_v55  ;;  %1275 = vmatpush.msrb.mxu2 %v1211_v56 }
 0x137   : > { %1295 = vmatpush.msrb.mxu3 %v1212_v57  ;;  %2795 = vmatmul.msk.f32.vlgmr.msra.gmra.mxu0 %vm425_vm0, %v2794_v54 }
 0x138   : > { %2796 = vmatmul.msk.f32.vlgmr.msra.gmra.mxu1 %vm425_vm0, %v2794_v54  ;;  %2797 = vmatmul.msk.f32.vlgmr.msra.gmra.mxu2 %vm425_vm0, %v2794_v54 }
 0x139   : > { %2798 = vmatmul.msk.f32.vlgmr.msra.gmra.mxu3 %vm425_vm0, %v2794_v54  ;;  %1383 = vmatpush.msra.mxu2 %v1319_v58  ;;  %v2956_v59 = vpop.permute.xlu0 %2955 }
 0x13a   : > { %v2951_v63 = vpop.permute.xlu1 %2950  ;;  %v2958_v3 = vunpack.i.h.bf16 %v2956_v59  ;;  %v2957_v4 = vunpack.i.l.bf16 %v2956_v59 }
 0x13b   : > { %v2953_v0 = vunpack.i.h.bf16 %v2951_v63  ;;  %v2952_v1 = vunpack.i.l.bf16 %v2951_v63 }
 0x13c   : > { %v1427_v8 = vsel %vm1424_vm13, %v2957_v4, %v2958_v3 }
 0x13d   : > { %v1317_v5 = vsel %vm1316_vm12, %v1307_v62, %v2953_v0  ;;  %v1318_v6 = vsel %vm1316_vm12, %v2953_v0, %v2947_v53  ;;  %v1320_v7 = vsel %vm1316_vm12, %v2948_v52, %v2952_v1 }
 0x13e   : > { %1343 = vmatpush.msra.mxu0 %v1317_v5  ;;  %1363 = vmatpush.msra.mxu1 %v1318_v6 }
 0x13f   : > { %1403 = vmatpush.msra.mxu3 %v1320_v7  ;;  %2800 = vmatmul.msk.f32.vlgmr.msrb.gmra.mxu0 %vm425_vm0, %v2799_v2 }
 0x140   : > { %2801 = vmatmul.msk.f32.vlgmr.msrb.gmra.mxu1 %vm425_vm0, %v2799_v2  ;;  %2802 = vmatmul.msk.f32.vlgmr.msrb.gmra.mxu2 %vm425_vm0, %v2799_v2 }
 0x141   : > { %2803 = vmatmul.msk.f32.vlgmr.msrb.gmra.mxu3 %vm425_vm0, %v2799_v2  ;;  %1491 = vmatpush.msrb.mxu2 %v1427_v8  ;;  %v2966_v9 = vpop.permute.xlu0 %2965 }
 0x142   : > { %v2961_v10 = vpop.permute.xlu1 %2960  ;;  %v2968_v14 = vunpack.i.h.bf16 %v2966_v9  ;;  %v2967_v15 = vunpack.i.l.bf16 %v2966_v9 }
 0x143   : > { %v2963_v11 = vunpack.i.h.bf16 %v2961_v10  ;;  %v2962_v12 = vunpack.i.l.bf16 %v2961_v10 }
 0x144   : > { %v1535_v20 = vsel %vm1532_vm14, %v2967_v15, %v2968_v14 }
 0x145   : > { %v1425_v17 = vsel %vm1424_vm13, %v1415_v13, %v2963_v11  ;;  %v1426_v18 = vsel %vm1424_vm13, %v2963_v11, %v2957_v4  ;;  %v1428_v19 = vsel %vm1424_vm13, %v2958_v3, %v2962_v12 }
 0x146   : > { %1451 = vmatpush.msrb.mxu0 %v1425_v17  ;;  %1471 = vmatpush.msrb.mxu1 %v1426_v18 }
 0x147   : > { %1511 = vmatpush.msrb.mxu3 %v1428_v19  ;;  %2805 = vmatmul.msk.f32.vlgmr.msra.gmra.mxu0 %vm425_vm0, %v2804_v16 }
 0x148   : > { %2806 = vmatmul.msk.f32.vlgmr.msra.gmra.mxu1 %vm425_vm0, %v2804_v16  ;;  %2807 = vmatmul.msk.f32.vlgmr.msra.gmra.mxu2 %vm425_vm0, %v2804_v16 }
 0x149   : > { %2808 = vmatmul.msk.f32.vlgmr.msra.gmra.mxu3 %vm425_vm0, %v2804_v16  ;;  %1599 = vmatpush.msra.mxu2 %v1535_v20  ;;  %v1525_v21 = vpop.permute.xlu0 %1524 }
 0x14a   : > { %v1534_v22 = vsel %vm1532_vm14, %v1525_v21, %v2967_v15  ;;  %v1531_v23 = vpop.permute.xlu1 %1530 }
 0x14b   : > { %v1536_v24 = vsel %vm1532_vm14, %v2968_v14, %v1531_v23  ;;  %1579 = vmatpush.msra.mxu1 %v1534_v22 }
 0x14c   : > { %1619 = vmatpush.msra.mxu3 %v1536_v24 }
 0x14f   : > { %2810 = vmatmul.msk.f32.vlgmr.msrb.gmra.mxu0 %vm425_vm0, %v2809_v25 }
 0x150   : > { %2811 = vmatmul.msk.f32.vlgmr.msrb.gmra.mxu1 %vm425_vm0, %v2809_v25  ;;  %2812 = vmatmul.msk.f32.vlgmr.msrb.gmra.mxu2 %vm425_vm0, %v2809_v25 }
 0x151   : > { %2813 = vmatmul.msk.f32.vlgmr.msrb.gmra.mxu3 %vm425_vm0, %v2809_v25 }
 0x152   : > { %v1523_v26 = vpop.permute.xlu1 %1522 }
 0x153   : > { %v1533_v27 = vsel %vm1532_vm14, %v1523_v26, %v1525_v21 }
 0x154   : > { %1559 = vmatpush.msra.mxu0 %v1533_v27 }
 0x157   : > { %2815 = vmatmul.msk.f32.vlgmr.msra.gmra.mxu0 %vm425_vm0, %v2814_v28 }
 0x158   : > { %2816 = vmatmul.msk.f32.vlgmr.msra.gmra.mxu1 %vm425_vm0, %v2814_v28  ;;  %2817 = vmatmul.msk.f32.vlgmr.msra.gmra.mxu2 %vm425_vm0, %v2814_v28 }
 0x159   : > { %2818 = vmatmul.msk.f32.vlgmr.msra.gmra.mxu3 %vm425_vm0, %v2814_v28 }
 0x16e   : > { %v1631_v21 = vpop.permute.xlu2 %1630 }
 0x194   : > { %v716_v31 = vpop.f32.mrf.mxu0 }
 0x195   : > { %v736_v32 = vpop.f32.mrf.mxu1 }
 0x19b   : > { %v756_v35 = vpop.f32.mrf.mxu2 }
 0x19c   : > { %v776_v38 = vpop.f32.mrf.mxu3  ;;  %v818_v39 = vpop.f32.mrf.mxu0 }
 0x19d   : > { %v838_v40 = vpop.f32.mrf.mxu1  ;;  %v819_v61 = vadd.f32 %v818_v39, %v716_v31 }
 0x19e   : > { %v839_v57 = vadd.f32 %v838_v40, %v736_v32 }
 0x1a3   : > { %v858_v41 = vpop.f32.mrf.mxu2 }
 0x1a4   : > { %v878_v42 = vpop.f32.mrf.mxu3  ;;  %v922_v43 = vpop.f32.mrf.mxu0  ;;  %v859_v1 = vadd.f32 %v858_v41, %v756_v35  ;;  %v1667_v41 = vld [vmem:[%s3536_s1 + $0x1] sm:$0xf] }
 0x1a5   : > { %v942_v44 = vpop.f32.mrf.mxu1  ;;  %v985_v0 = vadd.f32 %v922_v43, %v819_v61  ;;  %v879_v11 = vadd.f32 %v878_v42, %v776_v38  ;;  %v1652_v42 = vpop.permute.xlu0 %1651 }
 0x1a6   : > { %v986_v63 = vadd.f32 %v942_v44, %v839_v57 }
 0x1ab   : > { %v962_v45 = vpop.f32.mrf.mxu2 }
 0x1ac   : > { %v982_v46 = vpop.f32.mrf.mxu3  ;;  %v1030_v47 = vpop.f32.mrf.mxu0  ;;  %v987_v9 = vadd.f32 %v962_v45, %v859_v1  ;;  %v1671_v1 = vperm.slane %v1667_v41, 2 }
 0x1ad   : > { %v1050_v48 = vpop.f32.mrf.mxu1  ;;  %v1093_v4 = vadd.f32 %v1030_v47, %v985_v0  ;;  %v988_v14 = vadd.f32 %v982_v46, %v879_v11  ;;  %v1661_v47 = vpop.permute.xlu1 %1660 }
 0x1ae   : > { %v1094_v3 = vadd.f32 %v1050_v48, %v986_v63  ;;  %v1670_v63 = vperm.slane %v1667_v41, 1 }
 0x1b3   : > { %v1070_v49 = vpop.f32.mrf.mxu2 }
 0x1b4   : > { %v1090_v50 = vpop.f32.mrf.mxu3  ;;  %v1119_v51 = vpop.f32.mrf.mxu0  ;;  %v1095_v16 = vadd.f32 %v1070_v49, %v987_v9 }
 0x1b5   : > { %v1139_v52 = vpop.f32.mrf.mxu1  ;;  %v1182_v7 = vadd.f32 %v1119_v51, %v1093_v4  ;;  %v1096_v18 = vadd.f32 %v1090_v50, %v988_v14  ;;  %v1669_v51 = vperm.slane %v1667_v41, 0  ;;  %v3074_v14 = vmov 0.0  }
 0x1b6   : > { %v1183_v10 = vadd.f32 %v1139_v52, %v1094_v3 }
 0x1bb   : > { %v1159_v53 = vpop.f32.mrf.mxu2 }
 0x1bc   : > { %v1179_v54 = vpop.f32.mrf.mxu3  ;;  %v1237_v55 = vpop.f32.mrf.mxu0  ;;  %v1184_v22 = vadd.f32 %v1159_v53, %v1095_v16 }
 0x1bd   : > { %v1257_v56 = vpop.f32.mrf.mxu1  ;;  %v1300_v12 = vadd.f32 %v1237_v55, %v1182_v7  ;;  %v1185_v26 = vadd.f32 %v1179_v54, %v1096_v18  ;;  %v1685_v18 = vld [vmem:[%s3544_s9] sm:$0xff] }
 0x1be   : > { %v1301_v13 = vadd.f32 %v1257_v56, %v1183_v10 }
 0x1c3   : > { %v1277_v58 = vpop.f32.mrf.mxu2 }
 0x1c4   : > { %v1297_v59 = vpop.f32.mrf.mxu3  ;;  %v1345_v60 = vpop.f32.mrf.mxu0  ;;  %v1302_v29 = vadd.f32 %v1277_v58, %v1184_v22 }
 0x1c5   : > { %v1365_v62 = vpop.f32.mrf.mxu1  ;;  %v1408_v15 = vadd.f32 %v1345_v60, %v1300_v12  ;;  %v1303_v31 = vadd.f32 %v1297_v59, %v1185_v26 }
 0x1c6   : > { %v1409_v17 = vadd.f32 %v1365_v62, %v1301_v13 }
 0x1cb   : > { %v1385_v2 = vpop.f32.mrf.mxu2 }
 0x1cc   : > { %v1405_v5 = vpop.f32.mrf.mxu3  ;;  %v1453_v6 = vpop.f32.mrf.mxu0  ;;  %v1410_v35 = vadd.f32 %v1385_v2, %v1302_v29  ;;  %v1672_v2 = vperm.slane %v1667_v41, 3 }
 0x1cd   : > { %v1473_v8 = vpop.f32.mrf.mxu1  ;;  %v1516_v19 = vadd.f32 %v1453_v6, %v1408_v15  ;;  %v1411_v39 = vadd.f32 %v1405_v5, %v1303_v31 }
 0x1ce   : > { %v1517_v23 = vadd.f32 %v1473_v8, %v1409_v17  ;;  %v1687_v17 = vld [vmem:[%s3546_s11] sm:$0xff] }
 0x1d3   : > { %v1493_v20 = vpop.f32.mrf.mxu2 }
 0x1d4   : > { %v1513_v24 = vpop.f32.mrf.mxu3  ;;  %v1561_v25 = vpop.f32.mrf.mxu0  ;;  %v1518_v43 = vadd.f32 %v1493_v20, %v1410_v35 }
 0x1d5   : > { %v1624_v27 = vadd.f32 %v1561_v25, %v1516_v19  ;;  %v1581_v28 = vpop.f32.mrf.mxu1  ;;  %v1519_v45 = vadd.f32 %v1513_v24, %v1411_v39  ;;  %v1686_v19 = vld [vmem:[%s3545_s10] sm:$0xff]  ;;  %v3374_v39 = vld [vmem:[%s3543_s8 + $0x10] sm:$0xff] }
 0x1d6   : > { %v1625_v30 = vadd.f32 %v1581_v28, %v1517_v23  ;;  %v2819_v23 = vld [vmem:[%s3543_s8 + $0x8] sm:$0xff]  ;;  %v1688_v28 = vld [vmem:[%s3543_s8] sm:$0xff] }
 0x1d7   : > { %v1633_v32 = vadd.f32 %v1631_v21, %v1624_v27 }
 0x1d8   : > { %v1634_v38 = vadd.f32 %v1631_v21, %v1625_v30 }
 0x1d9   : > { %vm1637_vm15 = vcmp.ge.f32.partialorder %v1633_v32, 0.0  ;;  %v1641_v40 = vmul.f32 0.01, %v1633_v32 }
 0x1da   : > { %vm1638_vm1 = vcmp.ge.f32.partialorder %v1634_v38, 0.0  ;;  %v1642_v44 = vmul.f32 0.01, %v1634_v38 }
 0x1db   : > { %v1601_v46 = vpop.f32.mrf.mxu2  ;;  %v1645_v48 = vsel %vm1637_vm15, %v1633_v32, %v1641_v40 }
 0x1dc   : > { %v1626_v49 = vadd.f32 %v1601_v46, %v1518_v43  ;;  %v1621_v50 = vpop.f32.mrf.mxu3  ;;  %v1646_v52 = vsel %vm1638_vm1, %v1634_v38, %v1642_v44  ;;  %v1654_v53 = vmul.f32 %v1652_v42, %v1645_v48 }
 0x1dd   : > { %v1627_v54 = vadd.f32 %v1621_v50, %v1519_v45  ;;  %v1655_v58 = vmul.f32 %v1652_v42, %v1646_v52  ;;  %v3395_v52 = vld [vmem:[%s3543_s8 + $0x18] sm:$0xff] }
 0x1de   : > { %v1635_v55 = vadd.f32 %v1631_v21, %v1626_v49  ;;  %v1663_v56 = vadd.f32 %v1661_v47, %v1654_v53 }
 0x1df   : > { %v1636_v57 = vadd.f32 %v1631_v21, %v1627_v54  ;;  %v1664_v4 = vadd.f32 %v1661_v47, %v1655_v58 }
 0x1e0   : > { %vm1639_vm2 = vcmp.ge.f32.partialorder %v1635_v55, 0.0  ;;  %v1643_v59 = vmul.f32 0.01, %v1635_v55  ;;  %v3323_v60 = vmul.f32 %v1669_v51, %v1663_v56 }
 0x1e1   : > { %vm1640_vm3 = vcmp.ge.f32.partialorder %v1636_v57, 0.0  ;;  %v1644_v61 = vmul.f32 0.01, %v1636_v57  ;;  %v3326_v8 = vmul.f32 %v1670_v63, %v1664_v4 }
 0x1e2   : > { %v1647_v62 = vsel %vm1639_vm2, %v1635_v55, %v1643_v59  ;;  %1703 = vrot.lane.b32.xlu1 %v3323_v60, %s3068_s19  ;;  %v3011_v15 = vpack.i.bf16 %v3323_v60, %v3074_v14 }
 0x1e3   : > { %v1648_v0 = vsel %vm1640_vm3, %v1636_v57, %v1644_v61  ;;  %v1656_v3 = vmul.f32 %v1652_v42, %v1647_v62  ;;  %v3046_v16 = vpack.i.bf16 %v3326_v8, %v3323_v60 }
 0x1e4   : > { %v1657_v5 = vmul.f32 %v1652_v42, %v1648_v0 }
 0x1e5   : > { %v1665_v6 = vadd.f32 %v1661_v47, %v1656_v3 }
 0x1e6   : > { %v1666_v7 = vadd.f32 %v1661_v47, %v1657_v5 }
 0x1e7   : > { %v3328_v9 = vmul.f32 %v1671_v1, %v1665_v6  ;;  %v3417_v1 = vld [vmem:[%s3543_s8 + $0x20] sm:$0xff] }
 0x1e8   : > { %v3330_v10 = vmul.f32 %v1672_v2, %v1666_v7 }
 0x1e9   : > { %v2971_v11 = vpack.i.bf16 %v3328_v9, %v3326_v8 }
 0x1ea   : > { %1805 = vrot.lane.b32.xlu1 %v3323_v60, %s3069_s20  ;;  %v2991_v12 = vpack.i.bf16 0.0, %v3330_v10  ;;  %v3026_v13 = vpack.i.bf16 %v3330_v10, %v3328_v9 }
 0x1eb   : > { %2972 = vrot.lane.b32.xlu2 %v2971_v11, %s3068_s19 }
 0x1ec   : > { %2992 = vrot.lane.b32.xlu0 %v2991_v12, %s3068_s19  ;;  %s2866_s19 = sshll.u32 %s3549_s22, 5 }
 0x1f2   : > { %1909 = vrot.lane.b32.xlu1 %v3323_v60, %s3070_s23 }
 0x1f3   : > { %2977 = vrot.lane.b32.xlu2 %v2971_v11, %s3069_s20 }
 0x1f4   : > { %2997 = vrot.lane.b32.xlu0 %v2991_v12, %s3069_s20 }
 0x1fa   : > { %2017 = vrot.lane.b32.xlu1 %v3323_v60, %s3071_s24 }
 0x1fb   : > { %2982 = vrot.lane.b32.xlu2 %v2971_v11, %s3070_s23 }
 0x1fc   : > { %3002 = vrot.lane.b32.xlu0 %v2991_v12, %s3070_s23 }
 0x202   : > { %2224 = vrot.lane.b32.xlu1 %v3326_v8, %s3072_s25 }
 0x203   : > { %2987 = vrot.lane.b32.xlu2 %v2971_v11, %s3071_s24 }
 0x204   : > { %3007 = vrot.lane.b32.xlu0 %v2991_v12, %s3071_s24  ;;  %s3522_s24 = scalar_lea.vmem %s3547_s12, %s2866_s19 }
 0x20a   : > { %2332 = vrot.lane.b32.xlu1 %v3326_v8, %s3073_s26 }
 0x20b   : > { %3027 = vrot.lane.b32.xlu2 %v3026_v13, %s3072_s25 }
 0x20c   : > { %3012 = vrot.lane.b32.xlu0 %v3011_v15, %s3072_s25 }
 0x212   : > { %2440 = vrot.lane.b32.xlu1 %v3326_v8, %s3075_s27 }
 0x213   : > { %3032 = vrot.lane.b32.xlu2 %v3026_v13, %s3073_s26 }
 0x214   : > { %3017 = vrot.lane.b32.xlu0 %v3011_v15, %s3073_s26 }
 0x21a   : > { %3047 = vrot.lane.b32.xlu1 %v3046_v16, %s3076_s29 }
 0x21b   : > { %3037 = vrot.lane.b32.xlu2 %v3026_v13, %s3075_s27 }
 0x21c   : > { %3022 = vrot.lane.b32.xlu0 %v3011_v15, %s3075_s27  ;;  %v3441_v15 = vld [vmem:[%s3543_s8 + $0x28] sm:$0xff] }
 0x222   : > { %2684 = vperm.xlu1 %2970, %v1687_v17  }
 0x223   : > { %3042 = vrot.lane.b32.xlu2 %v3026_v13, %s3076_s29 }
 0x224   : > { %2554 = vrot.lane.b32.xlu0 %v3074_v14, %s3076_s29 }
 0x22b   : > { %2654 = vperm.xlu2 %2969, %v1685_v18  }
 0x22c   : > { %2675 = vperm.xlu0 %2893, %v1686_v19  }
 0x245   : > { %v2973_v20 = vpop.permute.xlu2 %2972 }
 0x246   : > { %v2975_v21 = vunpack.i.h.bf16 %v2973_v20  ;;  %v2974_v22 = vunpack.i.l.bf16 %v2973_v20 }
 0x248   : > { %v1714_v24 = vsel %vm1711_vm4, %v2974_v22, %v2975_v21 }
 0x249   : > { %1778 = vmatpush.msrb.mxu2 %v1714_v24 }
 0x24a   : > { %2822 = vmatmul.msk.f32.vlgmr.msrb.gmra.mxu2 %vm425_vm0, %v2819_v23 }
 0x24d   : > { %v2978_v25 = vpop.permute.xlu2 %2977 }
 0x24e   : > { %v2980_v26 = vunpack.i.h.bf16 %v2978_v25  ;;  %v2979_v27 = vunpack.i.l.bf16 %v2978_v25 }
 0x250   : > { %v1816_v29 = vsel %vm1813_vm5, %v2979_v27, %v2980_v26 }
 0x251   : > { %1880 = vmatpush.msra.mxu2 %v1816_v29 }
 0x252   : > { %2826 = vmatmul.msk.f32.vlgmr.msra.gmra.mxu2 %vm425_vm0, %v1688_v28 }
 0x254   : > { %v1704_v30 = vpop.permute.xlu1 %1703 }
 0x255   : > { %v3365_v31 = vpop.permute.xlu2 %2982  ;;  %v1713_v32 = vsel %vm1711_vm4, %v1704_v30, %v2974_v22 }
 0x256   : > { %v2985_v35 = vunpack.i.h.bf16 %v3365_v31  ;;  %v2984_v38 = vunpack.i.l.bf16 %v3365_v31  ;;  %1758 = vmatpush.msrb.mxu1 %v1713_v32 }
 0x257   : > { %2821 = vmatmul.msk.f32.vlgmr.msrb.gmra.mxu1 %vm425_vm0, %v2819_v23 }
 0x258   : > { %v1920_v40 = vsel %vm1917_vm6, %v2984_v38, %v2985_v35 }
 0x259   : > { %1984 = vmatpush.msrb.mxu2 %v1920_v40  ;;  %v2853_v40 = vld [vmem:[%s3543_s8 + $0x38] sm:$0xff] }
 0x25a   : > { %2831 = vmatmul.msk.f32.vlgmr.msrb.gmra.mxu2 %vm425_vm0, %v3374_v39 }
 0x25c   : > { %v1806_v41 = vpop.permute.xlu1 %1805 }
 0x25d   : > { %v3381_v42 = vpop.permute.xlu2 %2987  ;;  %v1815_v43 = vsel %vm1813_vm5, %v1806_v41, %v2979_v27 }
 0x25e   : > { %v2990_v44 = vunpack.i.h.bf16 %v3381_v42  ;;  %v2989_v45 = vunpack.i.l.bf16 %v3381_v42  ;;  %v2993_v46 = vpop.permute.xlu0 %2992  ;;  %1860 = vmatpush.msra.mxu1 %v1815_v43 }
 0x25f   : > { %v2995_v47 = vunpack.i.h.bf16 %v2993_v46  ;;  %v2994_v48 = vunpack.i.l.bf16 %v2993_v46  ;;  %2825 = vmatmul.msk.f32.vlgmr.msra.gmra.mxu1 %vm425_vm0, %v1688_v28 }
 0x260   : > { %v2028_v49 = vsel %vm2025_vm7, %v2989_v45, %v2990_v44 }
 0x261   : > { %v1712_v50 = vsel %vm1711_vm4, %v2995_v47, %v1704_v30  ;;  %v1715_v51 = vsel %vm1711_vm4, %v2975_v21, %v2994_v48  ;;  %2092 = vmatpush.msra.mxu2 %v2028_v49  ;;  %v2858_v48 = vld [vmem:[%s3543_s8 + $0x40] sm:$0xff] }
 0x262   : > { %1738 = vmatpush.msrb.mxu0 %v1712_v50  ;;  %1798 = vmatpush.msrb.mxu3 %v1715_v51 }
 0x263   : > { %2820 = vmatmul.msk.f32.vlgmr.msrb.gmra.mxu0 %vm425_vm0, %v2819_v23  ;;  %2823 = vmatmul.msk.f32.vlgmr.msrb.gmra.mxu3 %vm425_vm0, %v2819_v23 }
 0x264   : > { %2836 = vmatmul.msk.f32.vlgmr.msra.gmra.mxu2 %vm425_vm0, %v3395_v52  ;;  %v1910_v53 = vpop.permute.xlu1 %1909 }
 0x265   : > { %2181 = vmatpush.msrb.mxu2 %v3328_v9  ;;  %v1919_v54 = vsel %vm1917_vm6, %v1910_v53, %v2984_v38  ;;  %v3403_v55 = vpop.permute.xlu2 %3027 }
 0x266   : > { %v3030_v56 = vunpack.i.h.bf16 %v3403_v55  ;;  %v3029_v57 = vunpack.i.l.bf16 %v3403_v55  ;;  %v2998_v58 = vpop.permute.xlu0 %2997  ;;  %1964 = vmatpush.msrb.mxu1 %v1919_v54 }
 0x267   : > { %v3000_v59 = vunpack.i.h.bf16 %v2998_v58  ;;  %v2999_v61 = vunpack.i.l.bf16 %v2998_v58  ;;  %2830 = vmatmul.msk.f32.vlgmr.msrb.gmra.mxu1 %vm425_vm0, %v3374_v39 }
 0x268   : > { %v2235_v62 = vsel %vm2232_vm8, %v3029_v57, %v3030_v56 }
 0x269   : > { %v1814_v63 = vsel %vm1813_vm5, %v3000_v59, %v1806_v41  ;;  %v1817_v0 = vsel %vm1813_vm5, %v2980_v26, %v2999_v61  ;;  %2299 = vmatpush.msra.mxu2 %v2235_v62  ;;  %v2848_v26 = vld [vmem:[%s3543_s8 + $0x30] sm:$0xff] }
 0x26a   : > { %1840 = vmatpush.msra.mxu0 %v1814_v63  ;;  %1900 = vmatpush.msra.mxu3 %v1817_v0 }
 0x26b   : > { %2824 = vmatmul.msk.f32.vlgmr.msra.gmra.mxu0 %vm425_vm0, %v1688_v28  ;;  %2827 = vmatmul.msk.f32.vlgmr.msra.gmra.mxu3 %vm425_vm0, %v1688_v28 }
 0x26c   : > { %2841 = vmatmul.msk.f32.vlgmr.msrb.gmra.mxu2 %vm425_vm0, %v3417_v1  ;;  %v2018_v3 = vpop.permute.xlu1 %2017 }
 0x26d   : > { %v2027_v4 = vsel %vm2025_vm7, %v2018_v3, %v2989_v45  ;;  %v3424_v2 = vpop.permute.xlu2 %3032 }
 0x26e   : > { %v3035_v5 = vunpack.i.h.bf16 %v3424_v2  ;;  %v3034_v6 = vunpack.i.l.bf16 %v3424_v2  ;;  %v3003_v7 = vpop.permute.xlu0 %3002  ;;  %2072 = vmatpush.msra.mxu1 %v2027_v4 }
 0x26f   : > { %v3005_v9 = vunpack.i.h.bf16 %v3003_v7  ;;  %v3004_v11 = vunpack.i.l.bf16 %v3003_v7  ;;  %2835 = vmatmul.msk.f32.vlgmr.msra.gmra.mxu1 %vm425_vm0, %v3395_v52 }
 0x270   : > { %2161 = vmatpush.msrb.mxu1 %v3326_v8  ;;  %v2343_v12 = vsel %vm2340_vm9, %v3034_v6, %v3035_v5 }
 0x271   : > { %v1918_v13 = vsel %vm1917_vm6, %v3005_v9, %v1910_v53  ;;  %v1921_v14 = vsel %vm1917_vm6, %v2985_v35, %v3004_v11  ;;  %2407 = vmatpush.msrb.mxu2 %v2343_v12 }
 0x272   : > { %1944 = vmatpush.msrb.mxu0 %v1918_v13  ;;  %2004 = vmatpush.msrb.mxu3 %v1921_v14 }
 0x273   : > { %2829 = vmatmul.msk.f32.vlgmr.msrb.gmra.mxu0 %vm425_vm0, %v3374_v39  ;;  %2832 = vmatmul.msk.f32.vlgmr.msrb.gmra.mxu3 %vm425_vm0, %v3374_v39 }
 0x274   : > { %2846 = vmatmul.msk.f32.vlgmr.msra.gmra.mxu2 %vm425_vm0, %v3441_v15  ;;  %v2225_v8 = vpop.permute.xlu1 %2224 }
 0x275   : > { %v2234_v16 = vsel %vm2232_vm8, %v2225_v8, %v3029_v57  ;;  %v3450_v17 = vpop.permute.xlu2 %3037 }
 0x276   : > { %v3040_v18 = vunpack.i.h.bf16 %v3450_v17  ;;  %v3039_v19 = vunpack.i.l.bf16 %v3450_v17  ;;  %v3008_v20 = vpop.permute.xlu0 %3007  ;;  %2279 = vmatpush.msra.mxu1 %v2234_v16 }
 0x277   : > { %v3010_v21 = vunpack.i.h.bf16 %v3008_v20  ;;  %v3009_v22 = vunpack.i.l.bf16 %v3008_v20  ;;  %2840 = vmatmul.msk.f32.vlgmr.msrb.gmra.mxu1 %vm425_vm0, %v3417_v1 }
 0x278   : > { %v2451_v23 = vsel %vm2448_vm10, %v3039_v19, %v3040_v18 }
 0x279   : > { %v2026_v24 = vsel %vm2025_vm7, %v3010_v21, %v2018_v3  ;;  %v2029_v25 = vsel %vm2025_vm7, %v2990_v44, %v3009_v22  ;;  %2515 = vmatpush.msra.mxu2 %v2451_v23 }
 0x27a   : > { %2052 = vmatpush.msra.mxu0 %v2026_v24  ;;  %2112 = vmatpush.msra.mxu3 %v2029_v25 }
 0x27b   : > { %2834 = vmatmul.msk.f32.vlgmr.msra.gmra.mxu0 %vm425_vm0, %v3395_v52  ;;  %2837 = vmatmul.msk.f32.vlgmr.msra.gmra.mxu3 %vm425_vm0, %v3395_v52 }
 0x27c   : > { %2141 = vmatpush.msrb.mxu0 %v3323_v60  ;;  %2201 = vmatpush.msrb.mxu3 %v3330_v10  ;;  %v2333_v27 = vpop.permute.xlu1 %2332 }
 0x27d   : > { %2851 = vmatmul.msk.f32.vlgmr.msrb.gmra.mxu2 %vm425_vm0, %v2848_v26  ;;  %v2342_v28 = vsel %vm2340_vm9, %v2333_v27, %v3034_v6  ;;  %v3043_v29 = vpop.permute.xlu2 %3042 }
 0x27e   : > { %v3045_v30 = vunpack.i.h.bf16 %v3043_v29  ;;  %v3044_v31 = vunpack.i.l.bf16 %v3043_v29  ;;  %v3013_v32 = vpop.permute.xlu0 %3012  ;;  %2387 = vmatpush.msrb.mxu1 %v2342_v28 }
 0x27f   : > { %v3015_v35 = vunpack.i.h.bf16 %v3013_v32  ;;  %v3014_v38 = vunpack.i.l.bf16 %v3013_v32  ;;  %2845 = vmatmul.msk.f32.vlgmr.msra.gmra.mxu1 %vm425_vm0, %v3441_v15 }
 0x280   : > { %v2559_v60 = vsel %vm2556_vm11, %v3044_v31, %v3045_v30 }
 0x281   : > { %v2233_v10 = vsel %vm2232_vm8, %v3015_v35, %v2225_v8  ;;  %v2236_v39 = vsel %vm2232_vm8, %v3030_v56, %v3014_v38  ;;  %2623 = vmatpush.msrb.mxu2 %v2559_v60 }
 0x282   : > { %2259 = vmatpush.msra.mxu0 %v2233_v10  ;;  %2319 = vmatpush.msra.mxu3 %v2236_v39 }
 0x283   : > { %2839 = vmatmul.msk.f32.vlgmr.msrb.gmra.mxu0 %vm425_vm0, %v3417_v1  ;;  %2842 = vmatmul.msk.f32.vlgmr.msrb.gmra.mxu3 %vm425_vm0, %v3417_v1 }
 0x284   : > { %v2441_v41 = vpop.permute.xlu1 %2440 }
 0x285   : > { %2856 = vmatmul.msk.f32.vlgmr.msra.gmra.mxu2 %vm425_vm0, %v2853_v40  ;;  %v2450_v42 = vsel %vm2448_vm10, %v2441_v41, %v3039_v19 }
 0x286   : > { %v3018_v43 = vpop.permute.xlu0 %3017  ;;  %2495 = vmatpush.msra.mxu1 %v2450_v42 }
 0x287   : > { %v3020_v44 = vunpack.i.h.bf16 %v3018_v43  ;;  %v3019_v45 = vunpack.i.l.bf16 %v3018_v43  ;;  %2850 = vmatmul.msk.f32.vlgmr.msrb.gmra.mxu1 %vm425_vm0, %v2848_v26 }
 0x289   : > { %v2341_v46 = vsel %vm2340_vm9, %v3020_v44, %v2333_v27  ;;  %v2344_v47 = vsel %vm2340_vm9, %v3035_v5, %v3019_v45  ;;  %v2655_v45 = vpop.permute.xlu2 %2654 }
 0x28a   : > { %2367 = vmatpush.msrb.mxu0 %v2341_v46  ;;  %2427 = vmatpush.msrb.mxu3 %v2344_v47 }
 0x28b   : > { %2844 = vmatmul.msk.f32.vlgmr.msra.gmra.mxu0 %vm425_vm0, %v3441_v15  ;;  %2847 = vmatmul.msk.f32.vlgmr.msra.gmra.mxu3 %vm425_vm0, %v3441_v15 }
 0x28c   : > { %v3048_v49 = vpop.permute.xlu1 %3047 }
 0x28d   : > { %2861 = vmatmul.msk.f32.vlgmr.msrb.gmra.mxu2 %vm425_vm0, %v2858_v48  ;;  %v3050_v50 = vunpack.i.h.bf16 %v3048_v49  ;;  %v3049_v51 = vunpack.i.l.bf16 %v3048_v49 }
 0x28e   : > { %v3023_v52 = vpop.permute.xlu0 %3022 }
 0x28f   : > { %v3025_v53 = vunpack.i.h.bf16 %v3023_v52  ;;  %v3024_v54 = vunpack.i.l.bf16 %v3023_v52  ;;  %2855 = vmatmul.msk.f32.vlgmr.msra.gmra.mxu1 %vm425_vm0, %v2853_v40  ;;  %v2558_v55 = vsel %vm2556_vm11, %v3050_v50, %v3044_v31  ;;  %v2557_v58 = vsel %vm2556_vm11, %v3049_v51, %v3050_v50 }
 0x290   : > { %2603 = vmatpush.msrb.mxu1 %v2558_v55 }
 0x291   : > { %v2449_v56 = vsel %vm2448_vm10, %v3025_v53, %v2441_v41  ;;  %v2452_v57 = vsel %vm2448_vm10, %v3040_v18, %v3024_v54 }
 0x292   : > { %2475 = vmatpush.msra.mxu0 %v2449_v56  ;;  %2535 = vmatpush.msra.mxu3 %v2452_v57 }
 0x293   : > { %2849 = vmatmul.msk.f32.vlgmr.msrb.gmra.mxu0 %vm425_vm0, %v2848_v26  ;;  %2852 = vmatmul.msk.f32.vlgmr.msrb.gmra.mxu3 %vm425_vm0, %v2848_v26 }
 0x294   : > { %2583 = vmatpush.msrb.mxu0 %v2557_v58 }
 0x296   : > { %v2555_v59 = vpop.permute.xlu0 %2554 }
 0x297   : > { %v2560_v61 = vsel %vm2556_vm11, %v3045_v30, %v2555_v59  ;;  %2860 = vmatmul.msk.f32.vlgmr.msrb.gmra.mxu1 %vm425_vm0, %v2858_v48 }
 0x298   : > { %2643 = vmatpush.msrb.mxu3 %v2560_v61  ;;  %v2685_v61 = vpop.permute.xlu1 %2684 }
 0x29b   : > { %2854 = vmatmul.msk.f32.vlgmr.msra.gmra.mxu0 %vm425_vm0, %v2853_v40  ;;  %2857 = vmatmul.msk.f32.vlgmr.msra.gmra.mxu3 %vm425_vm0, %v2853_v40 }
 0x29e   : > { %v2676_v54 = vpop.permute.xlu0 %2675 }
 0x2a3   : > { %2859 = vmatmul.msk.f32.vlgmr.msrb.gmra.mxu0 %vm425_vm0, %v2858_v48  ;;  %2862 = vmatmul.msk.f32.vlgmr.msrb.gmra.mxu3 %vm425_vm0, %v2858_v48 }
 0x2cd   : > { %v1780_v62 = vpop.f32.mrf.mxu2 }
 0x2d4   : > { %v1760_v63 = vpop.f32.mrf.mxu1 }
 0x2d5   : > { %v1882_v0 = vpop.f32.mrf.mxu2 }
 0x2d6   : > { %v1883_v19 = vadd.f32 %v1882_v0, %v1780_v62 }
 0x2dc   : > { %v1862_v1 = vpop.f32.mrf.mxu1 }
 0x2dd   : > { %v1986_v3 = vpop.f32.mrf.mxu2  ;;  %v1863_v24 = vadd.f32 %v1862_v1, %v1760_v63 }
 0x2de   : > { %v2011_v22 = vadd.f32 %v1986_v3, %v1883_v19 }
 0x2e0   : > { %v1740_v4 = vpop.f32.mrf.mxu0 }
 0x2e4   : > { %v1966_v2 = vpop.f32.mrf.mxu1 }
 0x2e5   : > { %v2010_v29 = vadd.f32 %v1966_v2, %v1863_v24 }
 0x2e6   : > { %v1800_v5 = vpop.f32.mrf.mxu3 }
 0x2e7   : > { %v2094_v6 = vpop.f32.mrf.mxu2 }
 0x2e8   : > { %v1842_v7 = vpop.f32.mrf.mxu0  ;;  %v2119_v26 = vadd.f32 %v2094_v6, %v2011_v22 }
 0x2e9   : > { %v1843_v46 = vadd.f32 %v1842_v7, %v1740_v4 }
 0x2ec   : > { %v2074_v9 = vpop.f32.mrf.mxu1 }
 0x2ed   : > { %v2118_v31 = vadd.f32 %v2074_v9, %v2010_v29 }
 0x2ee   : > { %v1902_v11 = vpop.f32.mrf.mxu3 }
 0x2ef   : > { %v2183_v12 = vpop.f32.mrf.mxu2  ;;  %v1903_v62 = vadd.f32 %v1902_v11, %v1800_v5 }
 0x2f0   : > { %v1946_v13 = vpop.f32.mrf.mxu0  ;;  %v2208_v30 = vadd.f32 %v2183_v12, %v2119_v26 }
 0x2f1   : > { %v2009_v50 = vadd.f32 %v1946_v13, %v1843_v46 }
 0x2f4   : > { %v2163_v14 = vpop.f32.mrf.mxu1 }
 0x2f5   : > { %v2207_v38 = vadd.f32 %v2163_v14, %v2118_v31 }
 0x2f6   : > { %v2006_v15 = vpop.f32.mrf.mxu3 }
 0x2f7   : > { %v2301_v8 = vpop.f32.mrf.mxu2  ;;  %v2012_v3 = vadd.f32 %v2006_v15, %v1903_v62 }
 0x2f8   : > { %v2054_v16 = vpop.f32.mrf.mxu0  ;;  %v2326_v32 = vadd.f32 %v2301_v8, %v2208_v30 }
 0x2f9   : > { %v2117_v55 = vadd.f32 %v2054_v16, %v2009_v50 }
 0x2fc   : > { %v2281_v17 = vpop.f32.mrf.mxu1 }
 0x2fd   : > { %v2325_v39 = vadd.f32 %v2281_v17, %v2207_v38 }
 0x2fe   : > { %v2114_v18 = vpop.f32.mrf.mxu3 }
 0x2ff   : > { %v2120_v9 = vadd.f32 %v2114_v18, %v2012_v3 }
 0x300   : > { %v2409_v20 = vpop.f32.mrf.mxu2  ;;  %v2143_v21 = vpop.f32.mrf.mxu0 }
 0x301   : > { %v2434_v60 = vadd.f32 %v2409_v20, %v2326_v32  ;;  %v2206_v63 = vadd.f32 %v2143_v21, %v2117_v55 }
 0x304   : > { %v2389_v23 = vpop.f32.mrf.mxu1 }
 0x305   : > { %v2433_v43 = vadd.f32 %v2389_v23, %v2325_v39 }
 0x306   : > { %v2203_v25 = vpop.f32.mrf.mxu3 }
 0x307   : > { %v2209_v13 = vadd.f32 %v2203_v25, %v2120_v9 }
 0x308   : > { %v2517_v27 = vpop.f32.mrf.mxu2  ;;  %v2261_v28 = vpop.f32.mrf.mxu0 }
 0x309   : > { %v2542_v40 = vadd.f32 %v2517_v27, %v2434_v60  ;;  %v2324_v4 = vadd.f32 %v2261_v28, %v2206_v63 }
 0x30c   : > { %v2497_v35 = vpop.f32.mrf.mxu1 }
 0x30d   : > { %v2541_v47 = vadd.f32 %v2497_v35, %v2433_v43 }
 0x30e   : > { %v2321_v10 = vpop.f32.mrf.mxu3 }
 0x30f   : > { %v2327_v16 = vadd.f32 %v2321_v10, %v2209_v13 }
 0x310   : > { %v2625_v41 = vpop.f32.mrf.mxu2  ;;  %v2369_v42 = vpop.f32.mrf.mxu0 }
 0x311   : > { %v2650_v44 = vadd.f32 %v2625_v41, %v2542_v40  ;;  %v2432_v12 = vadd.f32 %v2369_v42, %v2324_v4 }
 0x313   : > { %v2659_v48 = vadd.f32 %v2655_v45, %v2650_v44 }
 0x314   : > { %v2605_v49 = vpop.f32.mrf.mxu1 }
 0x315   : > { %vm2663_vm0 = vcmp.ge.f32.partialorder %v2659_v48, 0.0  ;;  %v2667_v51 = vmul.f32 0.01, %v2659_v48  ;;  %v2649_v52 = vadd.f32 %v2605_v49, %v2541_v47 }
 0x316   : > { %v2429_v53 = vpop.f32.mrf.mxu3 }
 0x317   : > { %v2671_v56 = vsel %vm2663_vm0, %v2659_v48, %v2667_v51  ;;  %v2658_v57 = vadd.f32 %v2655_v45, %v2649_v52  ;;  %v2435_v19 = vadd.f32 %v2429_v53, %v2327_v16 }
 0x318   : > { %v2680_v58 = vmul.f32 %v2676_v54, %v2671_v56  ;;  %v2477_v59 = vpop.f32.mrf.mxu0 }
 0x319   : > { %vm2662_vm12 = vcmp.ge.f32.partialorder %v2658_v57, 0.0  ;;  %v2666_v0 = vmul.f32 0.01, %v2658_v57  ;;  %v2540_v14 = vadd.f32 %v2477_v59, %v2432_v12 }
 0x31a   : > { %v2689_v1 = vadd.f32 %v2685_v61, %v2680_v58 }
 0x31b   : > { %v2670_v2 = vsel %vm2662_vm12, %v2658_v57, %v2666_v0 }
 0x31c   : > { %v2697_v6 = vadd.f32 %v2689_v1, %v3192_v34  ;;  %v2679_v7 = vmul.f32 %v2676_v54, %v2670_v2 }
 0x31e   : > { %2701 = vst [vmem:[%s3522_s24 + $0x10] sm:$0xff] %v2697_v6  ;;  %v2688_v5 = vadd.f32 %v2685_v61, %v2679_v7  ;;  %v2537_v11 = vpop.f32.mrf.mxu3 }
 0x31f   : > { %v2543_v21 = vadd.f32 %v2537_v11, %v2435_v19 }
 0x320   : > { %v2696_v15 = vadd.f32 %v2688_v5, %v3190_v33  ;;  %v2585_v8 = vpop.f32.mrf.mxu0 }
 0x321   : > { %v2648_v17 = vadd.f32 %v2585_v8, %v2540_v14 }
 0x322   : > { %2700 = vst [vmem:[%s3522_s24 + $0x8] sm:$0xff] %v2696_v15 }
 0x323   : > { %v2657_v20 = vadd.f32 %v2655_v45, %v2648_v17 }
 0x325   : > { %vm2661_vm13 = vcmp.ge.f32.partialorder %v2657_v20, 0.0  ;;  %v2665_v34 = vmul.f32 0.01, %v2657_v20 }
 0x326   : > { %v2645_v18 = vpop.f32.mrf.mxu3 }
 0x327   : > { %v2669_v22 = vsel %vm2661_vm13, %v2657_v20, %v2665_v34  ;;  %v2651_v23 = vadd.f32 %v2645_v18, %v2543_v21 }
 0x328   : > { %v2678_v24 = vmul.f32 %v2676_v54, %v2669_v22 }
 0x329   : > { %v2660_v26 = vadd.f32 %v2655_v45, %v2651_v23 }
 0x32a   : > { %v2687_v25 = vadd.f32 %v2685_v61, %v2678_v24 }
 0x32b   : > { %vm2664_vm14 = vcmp.ge.f32.partialorder %v2660_v26, 0.0  ;;  %v2668_v27 = vmul.f32 0.01, %v2660_v26 }
 0x32c   : > { %v2695_v33 = vadd.f32 %v2687_v25, %v3194_v36 }
 0x32d   : > { %v2672_v28 = vsel %vm2664_vm14, %v2660_v26, %v2668_v27 }
 0x32e   : > { %2699 = vst [vmem:[%s3522_s24] sm:$0xff] %v2695_v33  ;;  %v2681_v29 = vmul.f32 %v2676_v54, %v2672_v28 }
 0x330   : > { %v2690_v30 = vadd.f32 %v2685_v61, %v2681_v29 }
 0x332   : > { %v2698_v31 = vadd.f32 %v2690_v30, %v3196_v37 }
 0x334   : > { %2702 = vst [vmem:[%s3522_s24 + $0x18] sm:$0xff] %v2698_v31 }
 0x335 PF: > { %s22_s21 = sadd.s32 1, %s3057_s21  }
 0x336   : > { %p19_p4 = scmp.ge.s32.totalorder %s22_s21, 4  }
 0x338   :  { %21 = sbr.rel (!%p19_p4) target bundleno = 1 (0x1), region = 114 }

</bundles_post_ra>
